<compile_context>
chip_gen: v5e
topology: v5e:2x2
jax: 0.10.0
libtpu: 0.0.40
codegen_flags: <defaults>
</compile_context>

<pallas_src>
from functools import partial

import jax
import jax.numpy as jnp
from jax.experimental import pallas as pl
from jax.experimental.pallas import tpu as pltpu


def _make_divisible(v, divisor, min_value=None):
    if min_value is None:
        min_value = divisor
    new_v = max(min_value, int(v + divisor / 2) // divisor * divisor)
    if new_v < 0.9 * v:
        new_v += divisor
    return new_v


def hardswish(x):
    # PyTorch nn.Hardswish: x * relu6(x + 3) / 6
    return x * jnp.clip(x + 3.0, 0.0, 6.0) * (1.0 / 6.0)


def hardsigmoid(x):
    # PyTorch nn.Hardsigmoid: clip(x/6 + 1/2, 0, 1)
    return jnp.clip(x * (1.0 / 6.0) + 0.5, 0.0, 1.0)


def inverted_residual_kernel(x_ref, pexp_ref, wdw_ref, pout_ref, m_ref, o_ref,
                             *, use_res, cin, cexp, csq, h, w, b_tile):
    """One grid step = b_tile images.  x_ref: (Cin, L); o_ref: (Cout, L),
    with L = b_tile * H * W (image b occupies lanes [b*HW, (b+1)*HW))."""
    hw = h * w
    lanes = b_tile * hw
    f32 = jnp.float32
    bf16 = jnp.bfloat16

    # Packed per-channel parameter lane offsets (must match pack_params).
    o_w1 = 0
    o_b1 = cin
    o_bdw = cin + 1
    o_bse2 = cin + 2
    o_wse1 = cin + 3
    o_wse2 = o_wse1 + csq
    o_bse1 = o_wse2 + csq

    x = x_ref[...]                                        # (Cin, L) f32

    # 1) expand 1x1 conv (BN folded) + Hardswish.
    #    bf16 MXU operands, f32 accumulation & elementwise.
    w1 = pexp_ref[:, o_w1:o_w1 + cin].astype(bf16)        # (Cexp, Cin)
    y = jnp.dot(w1, x.astype(bf16), preferred_element_type=f32)
    y = hardswish(y + pexp_ref[:, o_b1:o_b1 + 1])         # (Cexp, L)

    # 2) depthwise 3x3, stride 1, pad 1 (BN folded) + Hardswish.
    #    Separable lane-roll formulation: 2 column rolls + 2 row rolls (XLU),
    #    precomputed multiplicative 0/1 masks kill the W-border row wrap and
    #    the H-border / packed-image-seam wrap; three per-row partial sums
    #    keep the VPU dependence chain short.
    mxl = m_ref[0]                                        # col >= 1   (ox=-1 ok)
    mxr = m_ref[1]                                        # col <= W-2 (ox=+1 ok)
    myt = m_ref[2]                                        # row >= 1   (oy=-1 ok)
    myb = m_ref[3]                                        # row <= H-2 (oy=+1 ok)

    y_l = pltpu.roll(y, shift=1, axis=1) * mxl            # y[i-1], masked
    y_r = pltpu.roll(y, shift=lanes - 1, axis=1) * mxr    # y[i+1], masked

    def wtap(k):                                          # (Cexp, 1), lane-0
        return wdw_ref[k]

    g_top = y_l * wtap(0) + y * wtap(1) + y_r * wtap(2)   # taps (oy=-1, ox=*)
    g_mid = y_l * wtap(3) + y * wtap(4) + y_r * wtap(5)   # taps (oy= 0, ox=*)
    g_bot = y_l * wtap(6) + y * wtap(7) + y_r * wtap(8)   # taps (oy=+1, ox=*)
    acc = (pltpu.roll(g_top, shift=w, axis=1) * myt
           + g_mid
           + pltpu.roll(g_bot, shift=lanes - w, axis=1) * myb)
    z = hardswish(acc + pexp_ref[:, o_bdw:o_bdw + 1])     # (Cexp, L)

    # 3) Squeeze-Excite on VPU/XLU, per packed image (segmented reductions):
    #    masked-lane-sum avgpool -> FC+ReLU (sublane reduce)
    #    -> FC+Hardsigmoid (lane reduce) -> per-image, per-channel scale.
    wse1 = pexp_ref[:, o_wse1:o_wse1 + csq]               # (Cexp, Csq)
    wse2 = pexp_ref[:, o_wse2:o_wse2 + csq]               # (Cexp, Csq)
    bse1 = pexp_ref[0:1, o_bse1:o_bse1 + csq]             # (1, Csq)
    bse2 = pexp_ref[:, o_bse2:o_bse2 + 1]                 # (Cexp, 1)
    inv_hw = 1.0 / hw
    z_se = jnp.zeros_like(z)
    for b in range(b_tile):                               # static, small
        m_img = m_ref[4 + b]                              # (1, L) one-hot image
        zm = z * m_img                                    # (Cexp, L)
        s = jnp.sum(zm, axis=1, keepdims=True) * inv_hw   # (Cexp, 1) avgpool
        q = jnp.maximum(
            jnp.sum(wse1 * s, axis=0, keepdims=True) + bse1, 0.0)   # (1, Csq)
        e = hardsigmoid(
            jnp.sum(wse2 * q, axis=1, keepdims=True) + bse2)        # (Cexp, 1)
        z_se = z_se + zm * e
    z = z_se

    # 4) project 1x1 conv (BN folded), no activation; bf16 MXU operands.
    w2 = pout_ref[:, 0:cexp].astype(bf16)                 # (Cout, Cexp)
    out = jnp.dot(w2, z.astype(bf16), preferred_element_type=f32)
    out = out + pout_ref[:, cexp:cexp + 1]

    # 5) residual connection (f32 x, untouched by the bf16 operand rounding).
    if use_res:
        out = out + x
    o_ref[...] = out


def pack_params(params):
    """Pack parameters: pexp (Cexp, Cin+3+3*Csq), wdw9 (9, Cexp, 1), pout."""
    w1, b1, wdw, bdw, wse1, bse1, wse2, bse2, w2, b2 = params
    cexp, csq = wse1.shape
    pexp = jnp.concatenate(
        [w1,                                   # (Cexp, Cin)   lanes [0, Cin)
         b1,                                   # (Cexp, 1)     lane  Cin
         bdw,                                  # (Cexp, 1)     lane  Cin+1
         bse2,                                 # (Cexp, 1)     lane  Cin+2
         wse1,                                 # (Cexp, Csq)
         wse2,                                 # (Cexp, Csq)
         jnp.broadcast_to(bse1, (cexp, csq)),  # (Cexp, Csq); row 0 is used
         ], axis=1)
    wdw9 = wdw.T.reshape(9, cexp, 1)           # tap k at its own leading index
    pout = jnp.concatenate([w2, b2], axis=1)   # (Cout, Cexp + 1)
    return pexp, wdw9, pout


def build_masks(h, w, b_tile):
    """Host-precomputed 0/1 masks, shape (4 + b_tile, 1, b_tile*H*W) f32.
    Rows 0..3: W-left / W-right / H-top / H-bottom validity (per image, so
    they also kill packed-image seam wrap).  Rows 4..: one-hot image masks."""
    hw = h * w
    lanes = b_tile * hw
    lane = jnp.arange(lanes, dtype=jnp.int32)
    col = lane % w
    row = (lane % hw) // w
    img = lane // hw
    rows = [col >= 1, col <= w - 2, row >= 1, row <= h - 2]
    rows += [img == b for b in range(b_tile)]
    m = jnp.stack([r.astype(jnp.float32) for r in rows], axis=0)
    return m.reshape(4 + b_tile, 1, lanes)


def inverted_residual(x_nchw, params, use_res_connect=True, b_tile=2):
    """x_nchw: (N, Cin, H, W) float32 -> (N, Cout, H, W) float32."""
    x = x_nchw.astype(jnp.float32)
    n, cin, h, w_sp = x.shape
    w1, b1, wdw, bdw, wse1, bse1, wse2, bse2, w2, b2 = params
    cexp, csq = wse1.shape
    cout = w2.shape[0]
    hw = h * w_sp
    if n % b_tile != 0:
        b_tile = 1                 # fall back: no packing
    g = n // b_tile
    lanes = b_tile * hw

    pexp, wdw9, pout = pack_params(params)
    masks = build_masks(h, w_sp, b_tile)

    # Pack b_tile images along the lane axis (layout plumbing only: contiguous
    # HW rows are moved; at real resolutions HW is already lane-dense and
    # b_tile=1 makes this a pure reshape).
    xp = (x.reshape(g, b_tile, cin, hw)
            .transpose(0, 2, 1, 3)
            .reshape(g, cin, lanes))

    kernel = partial(inverted_residual_kernel, use_res=use_res_connect,
                     cin=cin, cexp=cexp, csq=csq, h=h, w=w_sp, b_tile=b_tile)
    out = pl.pallas_call(
        kernel,
        out_shape=jax.ShapeDtypeStruct((g, cout, lanes), jnp.float32),
        grid_spec=pltpu.PrefetchScalarGridSpec(
            num_scalar_prefetch=0,
            grid=(g,),
            in_specs=[
                pl.BlockSpec((None, cin, lanes), lambda i: (i, 0, 0)),
                pl.BlockSpec(pexp.shape, lambda i: (0, 0)),
                pl.BlockSpec(wdw9.shape, lambda i: (0, 0, 0)),
                pl.BlockSpec(pout.shape, lambda i: (0, 0)),
                pl.BlockSpec(masks.shape, lambda i: (0, 0, 0)),
            ],
            out_specs=pl.BlockSpec((None, cout, lanes), lambda i: (i, 0, 0)),
        ),
        compiler_params=pltpu.CompilerParams(
            dimension_semantics=("parallel",),
            vmem_limit_bytes=32 * 1024 * 1024),
    )(xp, pexp, wdw9, pout, masks)

    # Unpack the lane-packed images back to NCHW.
    out = (out.reshape(g, cout, b_tile, hw)
              .transpose(0, 2, 1, 3)
              .reshape(n, cout, h, w_sp))
    return out


def init_params(key, cin, cexp, csq, cout):
    """Deterministic synthetic parameters; BN folded into conv weight/bias."""
    keys = jax.random.split(key, 10)
    eps = 1e-5

    def conv_w(k, shape, fan_in):
        return (jax.random.normal(k, shape, jnp.float32)
                * (1.0 / jnp.sqrt(jnp.float32(fan_in))))

    def bn(k, c):
        k1, k2, k3, k4 = jax.random.split(k, 4)
        gamma = 1.0 + 0.1 * jax.random.normal(k1, (c,), jnp.float32)
        beta = 0.1 * jax.random.normal(k2, (c,), jnp.float32)
        mean = 0.1 * jax.random.normal(k3, (c,), jnp.float32)
        var = jnp.abs(jax.random.normal(k4, (c,), jnp.float32)) + 0.5
        scale = gamma / jnp.sqrt(var + eps)
        bias = beta - mean * scale
        return scale, bias

    # expand 1x1 conv (torch weight (Cexp, Cin, 1, 1)) stored as (Cexp, Cin)
    w1 = conv_w(keys[0], (cexp, cin), cin)
    s1, bb1 = bn(keys[1], cexp)
    w1 = w1 * s1[:, None]
    b1 = bb1[:, None]

    # depthwise 3x3 conv (torch weight (Cexp, 1, 3, 3)) stored as (Cexp, 9)
    wdw = conv_w(keys[2], (cexp, 9), 9)
    sdw, bbdw = bn(keys[3], cexp)
    wdw = wdw * sdw[:, None]
    bdw = bbdw[:, None]

    # SE: Linear(cexp->csq)+ReLU stored transposed as (Cexp, Csq);
    #     Linear(csq->cexp)+Hardsigmoid stored as (Cexp, Csq).
    wse1 = conv_w(keys[4], (cexp, csq), cexp)
    bse1 = (0.1 * jax.random.normal(keys[5], (csq,), jnp.float32))[None, :]
    wse2 = conv_w(keys[6], (cexp, csq), csq)
    bse2 = (0.1 * jax.random.normal(keys[7], (cexp,), jnp.float32))[:, None]

    # project 1x1 conv (torch weight (Cout, Cexp, 1, 1)) stored as (Cout, Cexp)
    w2 = conv_w(keys[8], (cout, cexp), cexp)
    s2, bb2 = bn(keys[9], cout)
    w2 = w2 * s2[:, None]
    b2 = bb2[:, None]

    return (w1, b1, wdw, bdw, wse1, bse1, wse2, bse2, w2, b2)


def reference_jax(x_nchw, params, use_res_connect=True):
    """Pure-JAX NCHW reference.  Mirrors the kernel's deliberate bf16 rounding
    of the two 1x1-conv MXU operands; everything else is f32 HIGHEST."""
    f32 = jnp.float32
    x = x_nchw.astype(f32)
    w1, b1, wdw, bdw, wse1, bse1, wse2, bse2, w2, b2 = params
    cexp = w1.shape[0]
    hi = jax.lax.Precision.HIGHEST
    rnd = lambda a: a.astype(jnp.bfloat16).astype(f32)

    y = hardswish(jnp.einsum('oc,nchw->nohw', rnd(w1), rnd(x), precision=hi)
                  + b1.reshape(1, cexp, 1, 1))
    wk = wdw.reshape(cexp, 1, 3, 3)                      # OIHW, groups=Cexp
    z = jax.lax.conv_general_dilated(
        y, wk, window_strides=(1, 1), padding=((1, 1), (1, 1)),
        dimension_numbers=('NCHW', 'OIHW', 'NCHW'),
        feature_group_count=cexp, precision=hi)
    z = hardswish(z + bdw.reshape(1, cexp, 1, 1))
    s = jnp.mean(z, axis=(2, 3))                         # (N, Cexp)
    q = jnp.maximum(jnp.einsum('nc,cs->ns', s, wse1, precision=hi)
                    + bse1[0], 0.0)                      # (N, Csq)
    e = hardsigmoid(jnp.einsum('ns,cs->nc', q, wse2, precision=hi)
                    + bse2[:, 0])                        # (N, Cexp)
    z = z * e[:, :, None, None]
    out = (jnp.einsum('oc,nchw->nohw', rnd(w2), rnd(z), precision=hi)
           + b2.reshape(1, -1, 1, 1))
    if use_res_connect:
        out = out + x
    return out


if __name__ == "__main__":
    # InvertedResidualConfig(16, 3, 32, 16, use_se=True, activation='HS',
    #                        stride=1, dilation=1, width_mult=1.0)
    cin = _make_divisible(16 * 1.0, 8)          # 16
    cexp = _make_divisible(32 * 1.0, 8)         # 32
    cout = _make_divisible(16 * 1.0, 8)         # 16
    csq = _make_divisible(cexp // 4, 8)         # 8
    use_res_connect = True                      # stride==1 and cin==cout

    # b_tile=2 packs two images per grid block: lane width = 2*16*16 = 512
    # (>=128-multiple, unmasked stores) and grid=(4,) gives both v7x cores
    # >=2 pipelined steps each.
    n, h, w = 8, 16, 16
    b_tile = 2
    key = jax.random.PRNGKey(0)
    kx, kp = jax.random.split(key)
    x = jax.random.normal(kx, (n, cin, h, w), jnp.float32)   # NCHW input

    params = init_params(kp, cin, cexp, csq, cout)

    out = jax.block_until_ready(
        inverted_residual(x, params, use_res_connect, b_tile=b_tile))
    ref = jax.block_until_ready(reference_jax(x, params, use_res_connect))

    assert out.shape == (n, cout, h, w)
    max_err = float(jnp.max(jnp.abs(out - ref)))
    # bf16 MXU operands (deliberate, mirrored in the reference) => bf16-level
    # tolerance; remaining differences are only accumulation-order noise.
    assert jnp.allclose(out, ref, atol=1e-2, rtol=1e-2), max_err

    print("KERNEL_OK")
</pallas_src>

<mosaic_0001>
module attributes {stable_mosaic.version = 11 : i64} {
  func.func @inverted_residual_kernel(%arg0: i32, %arg1: memref<1x16x512xf32, #tpu.memory_space<vmem>>, %arg2: memref<32x43xf32, #tpu.memory_space<vmem>>, %arg3: memref<9x32x1xf32, #tpu.memory_space<vmem>>, %arg4: memref<16x33xf32, #tpu.memory_space<vmem>>, %arg5: memref<6x1x512xf32, #tpu.memory_space<vmem>>, %arg6: memref<1x16x512xf32, #tpu.memory_space<vmem>>) attributes {dimension_semantics = [#tpu.dimension_semantics<parallel>], iteration_bounds = array<i64: 4>, scalar_prefetch = 0 : i64, scratch_operands = 0 : i64, tpu.core_type = #tpu.core_type<tc>, window_params = [{transform_indices = @transform_0, window_bounds = array<i64: 1, 16, 512>}, {pipeline_mode = #tpu.pipeline_mode<synchronous>, transform_indices = @transform_1, window_bounds = array<i64: 32, 43>}, {pipeline_mode = #tpu.pipeline_mode<synchronous>, transform_indices = @transform_2, window_bounds = array<i64: 9, 32, 1>}, {pipeline_mode = #tpu.pipeline_mode<synchronous>, transform_indices = @transform_3, window_bounds = array<i64: 16, 33>}, {pipeline_mode = #tpu.pipeline_mode<synchronous>, transform_indices = @transform_4, window_bounds = array<i64: 6, 1, 512>}, {transform_indices = @transform_5, window_bounds = array<i64: 1, 16, 512>}]} {
    %c0 = arith.constant 0 : index
    %c0_0 = arith.constant 0 : index
    %c0_1 = arith.constant 0 : index
    %0 = vector.load %arg1[%c0, %c0_0, %c0_1] : memref<1x16x512xf32, #tpu.memory_space<vmem>>, vector<1x16x512xf32>
    %1 = vector.shape_cast %0 : vector<1x16x512xf32> to vector<16x512xf32>
    %c0_2 = arith.constant 0 : index
    %c0_3 = arith.constant 0 : index
    %2 = vector.load %arg2[%c0_2, %c0_3] : memref<32x43xf32, #tpu.memory_space<vmem>>, vector<32x16xf32>
    %3 = arith.truncf %2 : vector<32x16xf32> to vector<32x16xbf16>
    %4 = arith.truncf %1 : vector<16x512xf32> to vector<16x512xbf16>
    %cst = arith.constant dense<0.000000e+00> : vector<32x512xf32>
    %5 = tpu.matmul %3, %4, %cst {dimension_numbers = #tpu.dot_dimension_numbers<[1], [0], [0], [1], [0, 0, 1, 1], [], []>} : vector<32x16xbf16>, vector<16x512xbf16>, vector<32x512xf32> -> vector<32x512xf32>
    %c0_4 = arith.constant 0 : index
    %c16 = arith.constant 16 : index
    %6 = vector.load %arg2[%c0_4, %c16] : memref<32x43xf32, #tpu.memory_space<vmem>>, vector<32x1xf32>
    %7 = vector.broadcast %6 : vector<32x1xf32> to vector<32x512xf32>
    %8 = arith.addf %5, %7 : vector<32x512xf32>
    %cst_5 = arith.constant 3.000000e+00 : f32
    %9 = vector.broadcast %cst_5 : f32 to vector<32x512xf32>
    %10 = arith.addf %8, %9 : vector<32x512xf32>
    %cst_6 = arith.constant 0.000000e+00 : f32
    %cst_7 = arith.constant 6.000000e+00 : f32
    %11 = vector.broadcast %cst_6 : f32 to vector<32x512xf32>
    %12 = arith.maximumf %11, %10 : vector<32x512xf32>
    %13 = vector.broadcast %cst_7 : f32 to vector<32x512xf32>
    %14 = arith.minimumf %13, %12 : vector<32x512xf32>
    %15 = arith.mulf %8, %14 : vector<32x512xf32>
    %cst_8 = arith.constant 0.166666672 : f32
    %16 = vector.broadcast %cst_8 : f32 to vector<32x512xf32>
    %17 = arith.mulf %15, %16 : vector<32x512xf32>
    %c0_9 = arith.constant 0 : index
    %c0_10 = arith.constant 0 : index
    %c0_11 = arith.constant 0 : index
    %18 = vector.load %arg5[%c0_9, %c0_10, %c0_11] : memref<6x1x512xf32, #tpu.memory_space<vmem>>, vector<1x1x512xf32>
    %19 = vector.shape_cast %18 : vector<1x1x512xf32> to vector<1x512xf32>
    %c1 = arith.constant 1 : index
    %c0_12 = arith.constant 0 : index
    %c0_13 = arith.constant 0 : index
    %20 = vector.load %arg5[%c1, %c0_12, %c0_13] : memref<6x1x512xf32, #tpu.memory_space<vmem>>, vector<1x1x512xf32>
    %21 = vector.shape_cast %20 : vector<1x1x512xf32> to vector<1x512xf32>
    %c2 = arith.constant 2 : index
    %c0_14 = arith.constant 0 : index
    %c0_15 = arith.constant 0 : index
    %22 = vector.load %arg5[%c2, %c0_14, %c0_15] : memref<6x1x512xf32, #tpu.memory_space<vmem>>, vector<1x1x512xf32>
    %23 = vector.shape_cast %22 : vector<1x1x512xf32> to vector<1x512xf32>
    %c3 = arith.constant 3 : index
    %c0_16 = arith.constant 0 : index
    %c0_17 = arith.constant 0 : index
    %24 = vector.load %arg5[%c3, %c0_16, %c0_17] : memref<6x1x512xf32, #tpu.memory_space<vmem>>, vector<1x1x512xf32>
    %25 = vector.shape_cast %24 : vector<1x1x512xf32> to vector<1x512xf32>
    %c1_i32 = arith.constant 1 : i32
    %26 = tpu.dynamic_rotate %17 by %c1_i32 dim 1 : vector<32x512xf32>, i32 -> vector<32x512xf32>
    %27 = vector.broadcast %19 : vector<1x512xf32> to vector<32x512xf32>
    %28 = arith.mulf %26, %27 : vector<32x512xf32>
    %c511_i32 = arith.constant 511 : i32
    %29 = tpu.dynamic_rotate %17 by %c511_i32 dim 1 : vector<32x512xf32>, i32 -> vector<32x512xf32>
    %30 = vector.broadcast %21 : vector<1x512xf32> to vector<32x512xf32>
    %31 = arith.mulf %29, %30 : vector<32x512xf32>
    %c0_18 = arith.constant 0 : index
    %c0_19 = arith.constant 0 : index
    %c0_20 = arith.constant 0 : index
    %32 = vector.load %arg3[%c0_18, %c0_19, %c0_20] : memref<9x32x1xf32, #tpu.memory_space<vmem>>, vector<1x32x1xf32>
    %33 = vector.shape_cast %32 : vector<1x32x1xf32> to vector<32x1xf32>
    %34 = vector.broadcast %33 : vector<32x1xf32> to vector<32x512xf32>
    %35 = arith.mulf %28, %34 : vector<32x512xf32>
    %c1_21 = arith.constant 1 : index
    %c0_22 = arith.constant 0 : index
    %c0_23 = arith.constant 0 : index
    %36 = vector.load %arg3[%c1_21, %c0_22, %c0_23] : memref<9x32x1xf32, #tpu.memory_space<vmem>>, vector<1x32x1xf32>
    %37 = vector.shape_cast %36 : vector<1x32x1xf32> to vector<32x1xf32>
    %38 = vector.broadcast %37 : vector<32x1xf32> to vector<32x512xf32>
    %39 = arith.mulf %17, %38 : vector<32x512xf32>
    %40 = arith.addf %35, %39 : vector<32x512xf32>
    %c2_24 = arith.constant 2 : index
    %c0_25 = arith.constant 0 : index
    %c0_26 = arith.constant 0 : index
    %41 = vector.load %arg3[%c2_24, %c0_25, %c0_26] : memref<9x32x1xf32, #tpu.memory_space<vmem>>, vector<1x32x1xf32>
    %42 = vector.shape_cast %41 : vector<1x32x1xf32> to vector<32x1xf32>
    %43 = vector.broadcast %42 : vector<32x1xf32> to vector<32x512xf32>
    %44 = arith.mulf %31, %43 : vector<32x512xf32>
    %45 = arith.addf %40, %44 : vector<32x512xf32>
    %c3_27 = arith.constant 3 : index
    %c0_28 = arith.constant 0 : index
    %c0_29 = arith.constant 0 : index
    %46 = vector.load %arg3[%c3_27, %c0_28, %c0_29] : memref<9x32x1xf32, #tpu.memory_space<vmem>>, vector<1x32x1xf32>
    %47 = vector.shape_cast %46 : vector<1x32x1xf32> to vector<32x1xf32>
    %48 = vector.broadcast %47 : vector<32x1xf32> to vector<32x512xf32>
    %49 = arith.mulf %28, %48 : vector<32x512xf32>
    %c4 = arith.constant 4 : index
    %c0_30 = arith.constant 0 : index
    %c0_31 = arith.constant 0 : index
    %50 = vector.load %arg3[%c4, %c0_30, %c0_31] : memref<9x32x1xf32, #tpu.memory_space<vmem>>, vector<1x32x1xf32>
    %51 = vector.shape_cast %50 : vector<1x32x1xf32> to vector<32x1xf32>
    %52 = vector.broadcast %51 : vector<32x1xf32> to vector<32x512xf32>
    %53 = arith.mulf %17, %52 : vector<32x512xf32>
    %54 = arith.addf %49, %53 : vector<32x512xf32>
    %c5 = arith.constant 5 : index
    %c0_32 = arith.constant 0 : index
    %c0_33 = arith.constant 0 : index
    %55 = vector.load %arg3[%c5, %c0_32, %c0_33] : memref<9x32x1xf32, #tpu.memory_space<vmem>>, vector<1x32x1xf32>
    %56 = vector.shape_cast %55 : vector<1x32x1xf32> to vector<32x1xf32>
    %57 = vector.broadcast %56 : vector<32x1xf32> to vector<32x512xf32>
    %58 = arith.mulf %31, %57 : vector<32x512xf32>
    %59 = arith.addf %54, %58 : vector<32x512xf32>
    %c6 = arith.constant 6 : index
    %c0_34 = arith.constant 0 : index
    %c0_35 = arith.constant 0 : index
    %60 = vector.load %arg3[%c6, %c0_34, %c0_35] : memref<9x32x1xf32, #tpu.memory_space<vmem>>, vector<1x32x1xf32>
    %61 = vector.shape_cast %60 : vector<1x32x1xf32> to vector<32x1xf32>
    %62 = vector.broadcast %61 : vector<32x1xf32> to vector<32x512xf32>
    %63 = arith.mulf %28, %62 : vector<32x512xf32>
    %c7 = arith.constant 7 : index
    %c0_36 = arith.constant 0 : index
    %c0_37 = arith.constant 0 : index
    %64 = vector.load %arg3[%c7, %c0_36, %c0_37] : memref<9x32x1xf32, #tpu.memory_space<vmem>>, vector<1x32x1xf32>
    %65 = vector.shape_cast %64 : vector<1x32x1xf32> to vector<32x1xf32>
    %66 = vector.broadcast %65 : vector<32x1xf32> to vector<32x512xf32>
    %67 = arith.mulf %17, %66 : vector<32x512xf32>
    %68 = arith.addf %63, %67 : vector<32x512xf32>
    %c8 = arith.constant 8 : index
    %c0_38 = arith.constant 0 : index
    %c0_39 = arith.constant 0 : index
    %69 = vector.load %arg3[%c8, %c0_38, %c0_39] : memref<9x32x1xf32, #tpu.memory_space<vmem>>, vector<1x32x1xf32>
    %70 = vector.shape_cast %69 : vector<1x32x1xf32> to vector<32x1xf32>
    %71 = vector.broadcast %70 : vector<32x1xf32> to vector<32x512xf32>
    %72 = arith.mulf %31, %71 : vector<32x512xf32>
    %73 = arith.addf %68, %72 : vector<32x512xf32>
    %c16_i32 = arith.constant 16 : i32
    %74 = tpu.dynamic_rotate %45 by %c16_i32 dim 1 : vector<32x512xf32>, i32 -> vector<32x512xf32>
    %75 = vector.broadcast %23 : vector<1x512xf32> to vector<32x512xf32>
    %76 = arith.mulf %74, %75 : vector<32x512xf32>
    %77 = arith.addf %76, %59 : vector<32x512xf32>
    %c496_i32 = arith.constant 496 : i32
    %78 = tpu.dynamic_rotate %73 by %c496_i32 dim 1 : vector<32x512xf32>, i32 -> vector<32x512xf32>
    %79 = vector.broadcast %25 : vector<1x512xf32> to vector<32x512xf32>
    %80 = arith.mulf %78, %79 : vector<32x512xf32>
    %81 = arith.addf %77, %80 : vector<32x512xf32>
    %c0_40 = arith.constant 0 : index
    %c17 = arith.constant 17 : index
    %82 = vector.load %arg2[%c0_40, %c17] : memref<32x43xf32, #tpu.memory_space<vmem>>, vector<32x1xf32>
    %83 = vector.broadcast %82 : vector<32x1xf32> to vector<32x512xf32>
    %84 = arith.addf %81, %83 : vector<32x512xf32>
    %cst_41 = arith.constant 3.000000e+00 : f32
    %85 = vector.broadcast %cst_41 : f32 to vector<32x512xf32>
    %86 = arith.addf %84, %85 : vector<32x512xf32>
    %cst_42 = arith.constant 0.000000e+00 : f32
    %cst_43 = arith.constant 6.000000e+00 : f32
    %87 = vector.broadcast %cst_42 : f32 to vector<32x512xf32>
    %88 = arith.maximumf %87, %86 : vector<32x512xf32>
    %89 = vector.broadcast %cst_43 : f32 to vector<32x512xf32>
    %90 = arith.minimumf %89, %88 : vector<32x512xf32>
    %91 = arith.mulf %84, %90 : vector<32x512xf32>
    %cst_44 = arith.constant 0.166666672 : f32
    %92 = vector.broadcast %cst_44 : f32 to vector<32x512xf32>
    %93 = arith.mulf %91, %92 : vector<32x512xf32>
    %c0_45 = arith.constant 0 : index
    %c19 = arith.constant 19 : index
    %94 = vector.load %arg2[%c0_45, %c19] : memref<32x43xf32, #tpu.memory_space<vmem>>, vector<32x8xf32>
    %c0_46 = arith.constant 0 : index
    %c27 = arith.constant 27 : index
    %95 = vector.load %arg2[%c0_46, %c27] : memref<32x43xf32, #tpu.memory_space<vmem>>, vector<32x8xf32>
    %c0_47 = arith.constant 0 : index
    %c35 = arith.constant 35 : index
    %96 = vector.load %arg2[%c0_47, %c35] : memref<32x43xf32, #tpu.memory_space<vmem>>, vector<1x8xf32>
    %c0_48 = arith.constant 0 : index
    %c18 = arith.constant 18 : index
    %97 = vector.load %arg2[%c0_48, %c18] : memref<32x43xf32, #tpu.memory_space<vmem>>, vector<32x1xf32>
    %cst_49 = arith.constant 0.000000e+00 : f32
    %98 = vector.broadcast %cst_49 : f32 to vector<32x512xf32>
    %c4_50 = arith.constant 4 : index
    %c0_51 = arith.constant 0 : index
    %c0_52 = arith.constant 0 : index
    %99 = vector.load %arg5[%c4_50, %c0_51, %c0_52] : memref<6x1x512xf32, #tpu.memory_space<vmem>>, vector<1x1x512xf32>
    %100 = vector.shape_cast %99 : vector<1x1x512xf32> to vector<1x512xf32>
    %101 = vector.broadcast %100 : vector<1x512xf32> to vector<32x512xf32>
    %102 = arith.mulf %93, %101 : vector<32x512xf32>
    %cst_53 = arith.constant dense<0.000000e+00> : vector<32xf32>
    %103 = vector.multi_reduction <add>, %102, %cst_53 [1] : vector<32x512xf32> to vector<32xf32>
    %104 = vector.shape_cast %103 : vector<32xf32> to vector<32x1xf32>
    %cst_54 = arith.constant 3.906250e-03 : f32
    %105 = vector.broadcast %cst_54 : f32 to vector<32x1xf32>
    %106 = arith.mulf %104, %105 : vector<32x1xf32>
    %107 = vector.broadcast %106 : vector<32x1xf32> to vector<32x8xf32>
    %108 = arith.mulf %94, %107 : vector<32x8xf32>
    %cst_55 = arith.constant dense<0.000000e+00> : vector<8xf32>
    %109 = vector.multi_reduction <add>, %108, %cst_55 [0] : vector<32x8xf32> to vector<8xf32>
    %110 = vector.shape_cast %109 : vector<8xf32> to vector<1x8xf32>
    %111 = arith.addf %110, %96 : vector<1x8xf32>
    %cst_56 = arith.constant 0.000000e+00 : f32
    %112 = vector.broadcast %cst_56 : f32 to vector<1x8xf32>
    %113 = arith.maximumf %111, %112 : vector<1x8xf32>
    %114 = vector.broadcast %113 : vector<1x8xf32> to vector<32x8xf32>
    %115 = arith.mulf %95, %114 : vector<32x8xf32>
    %cst_57 = arith.constant dense<0.000000e+00> : vector<32xf32>
    %116 = vector.multi_reduction <add>, %115, %cst_57 [1] : vector<32x8xf32> to vector<32xf32>
    %117 = vector.shape_cast %116 : vector<32xf32> to vector<32x1xf32>
    %118 = arith.addf %117, %97 : vector<32x1xf32>
    %cst_58 = arith.constant 0.166666672 : f32
    %119 = vector.broadcast %cst_58 : f32 to vector<32x1xf32>
    %120 = arith.mulf %118, %119 : vector<32x1xf32>
    %cst_59 = arith.constant 5.000000e-01 : f32
    %121 = vector.broadcast %cst_59 : f32 to vector<32x1xf32>
    %122 = arith.addf %120, %121 : vector<32x1xf32>
    %cst_60 = arith.constant 0.000000e+00 : f32
    %cst_61 = arith.constant 1.000000e+00 : f32
    %123 = vector.broadcast %cst_60 : f32 to vector<32x1xf32>
    %124 = arith.maximumf %123, %122 : vector<32x1xf32>
    %125 = vector.broadcast %cst_61 : f32 to vector<32x1xf32>
    %126 = arith.minimumf %125, %124 : vector<32x1xf32>
    %127 = vector.broadcast %126 : vector<32x1xf32> to vector<32x512xf32>
    %128 = arith.mulf %102, %127 : vector<32x512xf32>
    %129 = arith.addf %98, %128 : vector<32x512xf32>
    %c5_62 = arith.constant 5 : index
    %c0_63 = arith.constant 0 : index
    %c0_64 = arith.constant 0 : index
    %130 = vector.load %arg5[%c5_62, %c0_63, %c0_64] : memref<6x1x512xf32, #tpu.memory_space<vmem>>, vector<1x1x512xf32>
    %131 = vector.shape_cast %130 : vector<1x1x512xf32> to vector<1x512xf32>
    %132 = vector.broadcast %131 : vector<1x512xf32> to vector<32x512xf32>
    %133 = arith.mulf %93, %132 : vector<32x512xf32>
    %cst_65 = arith.constant dense<0.000000e+00> : vector<32xf32>
    %134 = vector.multi_reduction <add>, %133, %cst_65 [1] : vector<32x512xf32> to vector<32xf32>
    %135 = vector.shape_cast %134 : vector<32xf32> to vector<32x1xf32>
    %cst_66 = arith.constant 3.906250e-03 : f32
    %136 = vector.broadcast %cst_66 : f32 to vector<32x1xf32>
    %137 = arith.mulf %135, %136 : vector<32x1xf32>
    %138 = vector.broadcast %137 : vector<32x1xf32> to vector<32x8xf32>
    %139 = arith.mulf %94, %138 : vector<32x8xf32>
    %cst_67 = arith.constant dense<0.000000e+00> : vector<8xf32>
    %140 = vector.multi_reduction <add>, %139, %cst_67 [0] : vector<32x8xf32> to vector<8xf32>
    %141 = vector.shape_cast %140 : vector<8xf32> to vector<1x8xf32>
    %142 = arith.addf %141, %96 : vector<1x8xf32>
    %cst_68 = arith.constant 0.000000e+00 : f32
    %143 = vector.broadcast %cst_68 : f32 to vector<1x8xf32>
    %144 = arith.maximumf %142, %143 : vector<1x8xf32>
    %145 = vector.broadcast %144 : vector<1x8xf32> to vector<32x8xf32>
    %146 = arith.mulf %95, %145 : vector<32x8xf32>
    %cst_69 = arith.constant dense<0.000000e+00> : vector<32xf32>
    %147 = vector.multi_reduction <add>, %146, %cst_69 [1] : vector<32x8xf32> to vector<32xf32>
    %148 = vector.shape_cast %147 : vector<32xf32> to vector<32x1xf32>
    %149 = arith.addf %148, %97 : vector<32x1xf32>
    %cst_70 = arith.constant 0.166666672 : f32
    %150 = vector.broadcast %cst_70 : f32 to vector<32x1xf32>
    %151 = arith.mulf %149, %150 : vector<32x1xf32>
    %cst_71 = arith.constant 5.000000e-01 : f32
    %152 = vector.broadcast %cst_71 : f32 to vector<32x1xf32>
    %153 = arith.addf %151, %152 : vector<32x1xf32>
    %cst_72 = arith.constant 0.000000e+00 : f32
    %cst_73 = arith.constant 1.000000e+00 : f32
    %154 = vector.broadcast %cst_72 : f32 to vector<32x1xf32>
    %155 = arith.maximumf %154, %153 : vector<32x1xf32>
    %156 = vector.broadcast %cst_73 : f32 to vector<32x1xf32>
    %157 = arith.minimumf %156, %155 : vector<32x1xf32>
    %158 = vector.broadcast %157 : vector<32x1xf32> to vector<32x512xf32>
    %159 = arith.mulf %133, %158 : vector<32x512xf32>
    %160 = arith.addf %129, %159 : vector<32x512xf32>
    %c0_74 = arith.constant 0 : index
    %c0_75 = arith.constant 0 : index
    %161 = vector.load %arg4[%c0_74, %c0_75] : memref<16x33xf32, #tpu.memory_space<vmem>>, vector<16x32xf32>
    %162 = arith.truncf %161 : vector<16x32xf32> to vector<16x32xbf16>
    %163 = arith.truncf %160 : vector<32x512xf32> to vector<32x512xbf16>
    %cst_76 = arith.constant dense<0.000000e+00> : vector<16x512xf32>
    %164 = tpu.matmul %162, %163, %cst_76 {dimension_numbers = #tpu.dot_dimension_numbers<[1], [0], [0], [1], [0, 0, 1, 1], [], []>} : vector<16x32xbf16>, vector<32x512xbf16>, vector<16x512xf32> -> vector<16x512xf32>
    %c0_77 = arith.constant 0 : index
    %c32 = arith.constant 32 : index
    %165 = vector.load %arg4[%c0_77, %c32] : memref<16x33xf32, #tpu.memory_space<vmem>>, vector<16x1xf32>
    %166 = vector.broadcast %165 : vector<16x1xf32> to vector<16x512xf32>
    %167 = arith.addf %164, %166 : vector<16x512xf32>
    %168 = arith.addf %167, %1 : vector<16x512xf32>
    %c0_78 = arith.constant 0 : index
    %c0_79 = arith.constant 0 : index
    %c0_80 = arith.constant 0 : index
    %169 = vector.load %arg6[%c0_78, %c0_79, %c0_80] : memref<1x16x512xf32, #tpu.memory_space<vmem>>, vector<1x16x512xf32>
    %170 = vector.shape_cast %169 : vector<1x16x512xf32> to vector<16x512xf32>
    %171 = vector.shape_cast %168 : vector<16x512xf32> to vector<1x16x512xf32>
    tpu.vector_store %arg6[%c0_78, %c0_79, %c0_80], %171 {strides = array<i32>} : memref<1x16x512xf32, #tpu.memory_space<vmem>>, vector<1x16x512xf32>,
    return
  }
  func.func @transform_0(%arg0: i32) -> (i32, i32, i32) {
    %c0_i32 = arith.constant 0 : i32
    %c0_i32_0 = arith.constant 0 : i32
    %c0_i32_1 = arith.constant 0 : i32
    return %arg0, %c0_i32, %c0_i32_0 : i32, i32, i32
  }
  func.func @transform_1(%arg0: i32) -> (i32, i32) {
    %c0_i32 = arith.constant 0 : i32
    %c0_i32_0 = arith.constant 0 : i32
    %c0_i32_1 = arith.constant 0 : i32
    return %c0_i32, %c0_i32_0 : i32, i32
  }
  func.func @transform_2(%arg0: i32) -> (i32, i32, i32) {
    %c0_i32 = arith.constant 0 : i32
    %c0_i32_0 = arith.constant 0 : i32
    %c0_i32_1 = arith.constant 0 : i32
    %c0_i32_2 = arith.constant 0 : i32
    return %c0_i32, %c0_i32_0, %c0_i32_1 : i32, i32, i32
  }
  func.func @transform_3(%arg0: i32) -> (i32, i32) {
    %c0_i32 = arith.constant 0 : i32
    %c0_i32_0 = arith.constant 0 : i32
    %c0_i32_1 = arith.constant 0 : i32
    return %c0_i32, %c0_i32_0 : i32, i32
  }
  func.func @transform_4(%arg0: i32) -> (i32, i32, i32) {
    %c0_i32 = arith.constant 0 : i32
    %c0_i32_0 = arith.constant 0 : i32
    %c0_i32_1 = arith.constant 0 : i32
    %c0_i32_2 = arith.constant 0 : i32
    return %c0_i32, %c0_i32_0, %c0_i32_1 : i32, i32, i32
  }
  func.func @transform_5(%arg0: i32) -> (i32, i32, i32) {
    %c0_i32 = arith.constant 0 : i32
    %c0_i32_0 = arith.constant 0 : i32
    %c0_i32_1 = arith.constant 0 : i32
    return %arg0, %c0_i32, %c0_i32_0 : i32, i32, i32
  }
}

</mosaic_0001>

<bundles_post_ra>
// kernel: tpu_custom_call.1
= control target key start
LH: loop header
LB: loop body
LE: loop exit
PB: predicated region body
PF: predicated region fallthrough
CT: control target
= control target key end

     0   :  { %10 = vsyncpa [#allocation3], 0  ;;  %s3717_s0 = inlined_call_operand.vmem [shape: f32[4,16,512], index: 0, kind: input, shape index: {}]   ;;  %s3718_s1 = inlined_call_operand.vmem [shape: f32[32,43], index: 1, kind: input, shape index: {}]   ;;  %s3719_s2 = inlined_call_operand.vmem [shape: f32[9,32,1], index: 2, kind: input, shape index: {}]   ;;  %s3720_s3 = inlined_call_operand.hbm [shape: f32[16,33], index: 3, kind: input, shape index: {}]   ;;  %s3721_s4 = inlined_call_operand.hbm [shape: f32[6,1,512], index: 4, kind: input, shape index: {}]   ;;  %s3722_s5 = inlined_call_operand.hbm [shape: f32[4,16,512], index: 5, kind: output, shape index: {}]  }
   0x1   :  { %11 = vsyncpa [#allocation6], 0 }
   0x2   :  { %12 = vsyncpa [#allocation4], 0 }
   0x3   :  { %14 = vsyncpa [#allocation4 + $0x1], 0  ;;  %s2279_s18 = smov 0   ;;  %s2281_s19 = smov 0  }
   0x4   :  { %s2283_s20 = smov 0   ;;  %s2285_s21 = smov 0  }
   0x5 LB: > { %s2300_s22 = sadd.s32 4294967295, %s2228_s21   ;;  %s1934_s23 = sadd.s32 4294967294, %s2228_s21   ;;  %s2228_s21 = sphi %s2285_s21, %s3841_s21   ;;  %s2224_s20 = sphi %s2283_s20, %s3840_s20   ;;  %s2220_s19 = sphi %s2281_s19, %s3839_s19   ;;  %s2216_s18 = sphi %s2279_s18, %s3838_s18  }
   0x6   : > { %s2304_s24 = sadd.s32 1, %s2228_s21   ;;  %s137_s25 = sadd.s32 1, %s2224_s20 }
   0x7   : > { %s134_s26 = ssub.s32 %s2228_s21, %s2304_s24  ;;  %p147_p0 = scmp.ne.s32.totalorder %s2224_s20, %s2220_s19 }
   0x8   : > { %p135_p1 = scmp.eq.s32.totalorder %s134_s26, 0  ;;  %p148_p2 = scmp.eq.s32.totalorder %s2300_s22, 3 }
   0x9   : > { %p153_p3 = scmp.ne.s32.totalorder %s2220_s19, %s2216_s18  ;;  %p154_p4 = scmp.eq.s32.totalorder %s1934_s23, 3 }
   0xa   : > { %s2315_s27 = scalar_select %p135_p1, %s2224_s20, %s137_s25  }
   0xb   : > { %p2317_p5 = por %p148_p2, %p147_p0  ;;  %p2321_p6 = por %p154_p4, %p153_p3 }
   0xc   : > { %p1935_p7 = scmp.ge.s32.totalorder %s2228_s21, 1  ;;  %p161_p8 = scmp.lt.s32.totalorder %s2228_s21, 5 }
   0xd   : > { %p2017_p9 = scmp.eq.s32.totalorder %s2300_s22, 0  ;;  %s178_s8 = sshll.u32 %s3720_s3, 4  ;;  %s179_s8 = int_to_ptr.hbm [resolvable:$true] %s178_s8 }
   0xe   : > { %p2328_p10 = pnand %p1935_p7, %p161_p8  ;;  %s2230_s9 = smov [#allocation2]  }
   0xf   : > { %s180_s10 = sshll.u32 %s2230_s9, 4  ;;  %s192_s13 = sshll.u32 %s3721_s4, 4  ;;  %s181_s10 = int_to_ptr.vmem [resolvable:$true] %s180_s10  ;;  %s193_s13 = int_to_ptr.hbm [resolvable:$true] %s192_s13 }
  0x10   : > { %p2006_p11 = pneg %p2328_p10  ;;  %s2231_s14 = smov 128  }
  0x11   : > { %s2232_s15 = smov 8   ;;  %s2233_s16 = smov [#allocation5]  }
  0x12   : > { %p2007_p12 = pnand %p2017_p9, %p2006_p11  ;;  %s194_s17 = sshll.u32 %s2233_s16, 4  ;;  %s195_s17 = int_to_ptr.vmem [resolvable:$true] %s194_s17 }
  0x13   : > { %s2234_s23 = smov 64   ;;  %s2235_s25 = smov 4  }
  0x14   : > { %2009 = dma.hbm_to_vmem [thread:$0]  (!%p2007_p12), %s179_s8, 256, %s181_s10, [#allocation3], %s2231_s14, %s2231_s14, %s2232_s15  }
  0x15   : > { %2012 = dma.hbm_to_vmem [thread:$0]  (!%p2007_p12), %s193_s13, 384, %s195_s17, [#allocation6], %s2234_s23, %s2234_s23, %s2235_s25  }
  0x16   : > { %218 = sbr.rel (%p2328_p10) target bundleno = 1354 (0x54a), region = 40 }
  0x1b   : > { %2203 = dma.done.wait (%p2017_p9), [#allocation3], 256  }
  0x1c   : > { %2205 = vsyncadd (%p2017_p9), [#allocation3], 4294967040 }
  0x1d   : > { %2207 = dma.done.wait (%p2017_p9), [#allocation6], 384  }
  0x1e   : > { %2209 = vsyncadd (%p2017_p9), [#allocation6], 4294966912  ;;  %p252_p13 = scmp.lt.s32.totalorder %s2300_s22, 3  ;;  %v2236_v0 = vmov 0   ;;  %v2237_v1 = vmov 16   ;;  %v618_v2 = vld [vmem:[%s3719_s2 + $0x10] sm:$0xff] }
  0x1f   : > { %2077 = vset.pattern.permute.xlu2 %v2236_v0  ;;  %2074 = vset.pattern.permute.xlu1 %v2237_v1  ;;  %v268_v3 = vld [vmem:[%s3718_s1 + $0x10] sm:$0xff]  ;;  %v2368_v4 = vld [vmem:[%s3718_s1] sm:$0xff]  ;;  %v267_v16 = vld [vmem:[%s3718_s1 + $0x8] sm:$0xff]  ;;  %vm296_vm0 = vcmask 130048   ;;  %s2239_s6 = smov 127   ;;  %s2241_s16 = smov 16  }
  0x20   : > { %2073 = vset.pattern.permute.xlu0 %v2237_v1  ;;  %s253_s26 = scalar_select %p252_p13, %s2300_s22, 3  ;;  %632 = vperm.xlu2 %2077, %v618_v2   ;;  %v270_v18 = vpack.c.bf16 %v267_v16, %v2368_v4  ;;  %v1953_v19 = vld [vmem:[%s3719_s2 + $0x20] sm:$0xff]  ;;  %v269_v20 = vld [vmem:[%s3718_s1 + $0x18] sm:$0xff]  ;;  %v617_v22 = vld [vmem:[%s3719_s2 + $0x8] sm:$0xff]  ;;  %vm1428_vm5 = vcmask 220312   ;;  %vm1473_vm6 = vcmask 64512  }
  0x21   : > { %288 = vperm.xlu1 %2074, %v268_v3   ;;  %278 = vperm.xlu0 %2073, %v2368_v4   ;;  %v1957_v21 = vld [vmem:[%s3719_s2 + $0x40] sm:$0xff]  ;;  %v271_v24 = vpack.c.bf16 %v269_v20, %v268_v3  ;;  %v1974_v25 = vld [vmem:[%s3719_s2 + $0xc8] sm:$0xff]  ;;  %v619_v26 = vld [vmem:[%s3719_s2 + $0x18] sm:$0xff]  ;;  %s2242_s17 = smov 112   ;;  %s2243_s13 = smov 8   ;;  %vm1758_vm7 = vcmask 261120  }
  0x22   : > { %s1994_s30 = sshll.u32 %s253_s26, 6  ;;  %v616_v23 = vld [vmem:[%s3719_s2] sm:$0xff]  ;;  %v1954_v27 = vld [vmem:[%s3719_s2 + $0x28] sm:$0xff]  ;;  %v1956_v28 = vld [vmem:[%s3719_s2 + $0x38] sm:$0xff]  ;;  %s2244_s14 = smov 101  }
  0x23   : > { %s2357_s8 = scalar_lea.vmem %s3717_s0, %s1994_s30  ;;  %v1955_v29 = vld [vmem:[%s3719_s2 + $0x30] sm:$0xff]  ;;  %v1958_v30 = vld [vmem:[%s3719_s2 + $0x48] sm:$0xff]  ;;  %v1973_v32 = vld [vmem:[%s3719_s2 + $0xc0] sm:$0xff]  ;;  %s2238_s30 = smov 1  }
  0x24   : > { %v258_v5 = vld [vmem:[%s2357_s8] sm:$0xff]  ;;  %v259_v7 = vld [vmem:[%s2357_s8 + $0x8] sm:$0xff]  ;;  %v260_v10 = vld [vmem:[%s2357_s8 + $0x10] sm:$0xff]  ;;  %s249_s15 = sand.u32 1, %s2220_s19   ;;  %s1995_s23 = sshll.u32 %s2300_s22, 6 }
  0x25   : > { %v262_v6 = vld [vmem:[%s2357_s8 + $0x20] sm:$0xff]  ;;  %v263_v9 = vld [vmem:[%s2357_s8 + $0x28] sm:$0xff]  ;;  %v264_v11 = vld [vmem:[%s2357_s8 + $0x30] sm:$0xff]  ;;  %s1835_s7 = scalar_lea.sflag [#allocation4], %s249_s15 }
  0x26   : > { %v272_v8 = vpack.c.bf16 %v262_v6, %v258_v5  ;;  %v273_v12 = vpack.c.bf16 %v263_v9, %v259_v7  ;;  %v274_v13 = vpack.c.bf16 %v264_v11, %v260_v10  ;;  %v261_v14 = vld [vmem:[%s2357_s8 + $0x18] sm:$0xff]  ;;  %v1979_v31 = vld [vmem:[%s3719_s2 + $0xf0] sm:$0xff]  ;;  %v1977_v33 = vld [vmem:[%s3719_s2 + $0xe0] sm:$0xff] }
  0x27   : > { %v265_v15 = vld [vmem:[%s2357_s8 + $0x38] sm:$0xff]  ;;  %v1978_v35 = vld [vmem:[%s3719_s2 + $0xe8] sm:$0xff]  ;;  %v1959_v36 = vld [vmem:[%s3719_s2 + $0x50] sm:$0xff] }
  0x28   : > { %310 = vmatpush.bf16.msra.mxu0 %v272_v8  ;;  %v275_v17 = vpack.c.bf16 %v265_v15, %v261_v14  ;;  %329 = vmatpush.bf16.msra.mxu1 %v273_v12  ;;  %v1960_v34 = vld [vmem:[%s3719_s2 + $0x58] sm:$0xff]  ;;  %v1983_v37 = vld [vmem:[%s3719_s2 + $0x110] sm:$0xff]  ;;  %v1981_v39 = vld [vmem:[%s3719_s2 + $0x100] sm:$0xff] }
  0x29   : > { %348 = vmatpush.bf16.msra.mxu2 %v274_v13  ;;  %663 = vperm.xlu2 %2077, %v1953_v19   ;;  %v1975_v38 = vld [vmem:[%s3719_s2 + $0xd0] sm:$0xff]  ;;  %v1962_v40 = vld [vmem:[%s3719_s2 + $0x68] sm:$0xff]  ;;  %v1976_v42 = vld [vmem:[%s3719_s2 + $0xd8] sm:$0xff] }
  0x2a   : > { %367 = vmatpush.bf16.msra.mxu3 %v275_v17  ;;  %293 = vperm.xlu1 %2074, %v269_v20   ;;  %v1982_v41 = vld [vmem:[%s3719_s2 + $0x108] sm:$0xff]  ;;  %v1963_v43 = vld [vmem:[%s3719_s2 + $0x70] sm:$0xff]  ;;  %v1980_v44 = vld [vmem:[%s3719_s2 + $0xf8] sm:$0xff] }
  0x2b   : > { %1945 = vmatmul.msk.bf16.vlgmr.msra.gmra.mxu0 %vm296_vm0, %v270_v18  ;;  %1947 = vmatmul.msk.bf16.vlgmr.msra.gmra.mxu1 %vm296_vm0, %v270_v18  ;;  %v1984_v45 = vld [vmem:[%s3719_s2 + $0x118] sm:$0xff]  ;;  %v1970_v46 = vld [vmem:[%s3719_s2 + $0xa8] sm:$0xff]  ;;  %v1961_v47 = vld [vmem:[%s3719_s2 + $0x60] sm:$0xff] }
  0x2c   : > { %1949 = vmatmul.msk.bf16.vlgmr.msra.gmra.mxu2 %vm296_vm0, %v270_v18  ;;  %283 = vperm.xlu0 %2073, %v267_v16   ;;  %v1965_v48 = vld [vmem:[%s3719_s2 + $0x80] sm:$0xff]  ;;  %v1966_v49 = vld [vmem:[%s3719_s2 + $0x88] sm:$0xff]  ;;  %v1967_v50 = vld [vmem:[%s3719_s2 + $0x90] sm:$0xff] }
  0x2d   : > { %1951 = vmatmul.msk.bf16.vlgmr.msra.gmra.mxu3 %vm296_vm0, %v270_v18  ;;  %v1969_v51 = vld [vmem:[%s3719_s2 + $0xa0] sm:$0xff] }
  0x31   : > { %720 = vperm.xlu2 %2077, %v1957_v21  }
  0x32   : > { %2076 = vset.pattern.permute.xlu1 %v2236_v0 }
  0x33   : > { %627 = vperm.xlu1 %2076, %v617_v22  }
  0x34   : > { %2075 = vset.pattern.permute.xlu0 %v2236_v0 }
  0x35   : > { %622 = vperm.xlu0 %2075, %v616_v23  }
  0x39   : > { %937 = vperm.xlu2 %2077, %v1974_v25  }
  0x3b   : > { %1946 = vmatmul.msk.bf16.gmra.mxu0 %vm296_vm0, %v271_v24  ;;  %1948 = vmatmul.msk.bf16.gmra.mxu1 %vm296_vm0, %v271_v24 }
  0x3c   : > { %1950 = vmatmul.msk.bf16.gmra.mxu2 %vm296_vm0, %v271_v24  ;;  %637 = vperm.xlu1 %2076, %v619_v26  }
  0x3d   : > { %1952 = vmatmul.msk.bf16.gmra.mxu3 %vm296_vm0, %v271_v24  ;;  %668 = vperm.xlu0 %2075, %v1954_v27  }
  0x41   : > { %678 = vperm.xlu2 %2077, %v1956_v28  }
  0x44   : > { %673 = vperm.xlu1 %2076, %v1955_v29  }
  0x45   : > { %725 = vperm.xlu0 %2075, %v1958_v30  }
  0x49   : > { %983 = vperm.xlu2 %2077, %v1979_v31  }
  0x4c   : > { %932 = vperm.xlu1 %2076, %v1973_v32  }
  0x4d   : > { %973 = vperm.xlu0 %2075, %v1977_v33  }
  0x51   : > { %735 = vperm.xlu2 %2077, %v1960_v34  }
  0x54   : > { %978 = vperm.xlu1 %2076, %v1978_v35  }
  0x55   : > { %730 = vperm.xlu0 %2075, %v1959_v36  }
  0x59   : > { %1040 = vperm.xlu2 %2077, %v1983_v37  }
  0x5c   : > { %942 = vperm.xlu1 %2076, %v1975_v38  }
  0x5d   : > { %1030 = vperm.xlu0 %2075, %v1981_v39  }
  0x61   : > { %782 = vperm.xlu2 %2077, %v1962_v40  }
  0x64   : > { %1035 = vperm.xlu1 %2076, %v1982_v41  }
  0x65   : > { %947 = vperm.xlu0 %2075, %v1976_v42  }
  0x69   : > { %787 = vperm.xlu2 %2077, %v1963_v43  }
  0x6c   : > { %988 = vperm.xlu1 %2076, %v1980_v44  }
  0x6d   : > { %1045 = vperm.xlu0 %2075, %v1984_v45  }
  0x71   : > { %880 = vperm.xlu2 %2077, %v1970_v46  }
  0x74   : > { %777 = vperm.xlu1 %2076, %v1961_v47  }
  0x75   : > { %818 = vperm.xlu0 %2075, %v1965_v48  }
  0x7a   : > { %v2487_v52 = vpop.permute.xlu2 %632 }
  0x7b   : > { %3750 = vst [vmem:[#allocation11_spill] sm:$0xff] %v2487_v52 }
  0x7c   : > { %823 = vperm.xlu1 %2076, %v1966_v49  }
  0x7d   : > { %828 = vperm.xlu0 %2075, %v1967_v50  }
  0x83   : > { %v2491_v55 = vpop.permute.xlu2 %663 }
  0x84   : > { %875 = vperm.xlu1 %2076, %v1969_v51  }
  0x8b   : > { %v2497_v62 = vpop.permute.xlu2 %720 }
  0x93   : > { %v2489_v53 = vpop.permute.xlu1 %288  ;;  %v279_v54 = vpop.permute.xlu0 %278 }
  0x94   : > { %v2507_v24 = vpop.permute.xlu2 %937 }
  0x9c   : > { %v2493_v56 = vpop.permute.xlu1 %293 }
  0x9e   : > { %v284_v57 = vpop.permute.xlu0 %283 }
  0xa5   : > { %v2495_v61 = vpop.permute.xlu1 %627 }
  0xa7   : > { %v2499_v0 = vpop.permute.xlu0 %622 }
  0xa8   : > { %v312_v58 = vpop.f32.mrf.mxu0  ;;  %v331_v60 = vpop.f32.mrf.mxu1 }
  0xa9   : > { %v313_v59 = vadd.f32 %v312_v58, %v279_v54  ;;  %v332_v63 = vadd.f32 %v331_v60, %v279_v54 }
  0xab   : > { %v379_v1 = vadd.f32 3.0, %v313_v59  ;;  %v380_v2 = vadd.f32 3.0, %v332_v63 }
  0xad   : > { %v395_v3 = vmax.f32 %v379_v1, 0.0  ;;  %v396_v5 = vmax.f32 %v380_v2, 0.0 }
  0xae   : > { %v2501_v16 = vpop.permute.xlu1 %637 }
  0xaf   : > { %v411_v6 = vmin.f32 %v395_v3, 6.0  ;;  %v350_v7 = vpop.f32.mrf.mxu2  ;;  %v412_v8 = vmin.f32 %v396_v5, 6.0  ;;  %3751 = vst [vmem:[#allocation12_spill] sm:$0xff] %v2501_v16  ;;  %v2503_v20 = vpop.permute.xlu0 %668 }
  0xb0   : > { %v351_v9 = vadd.f32 %v350_v7, %v279_v54  ;;  %v369_v10 = vpop.f32.mrf.mxu3  ;;  %v314_v11 = vpop.f32.mrf.mxu0 }
  0xb1   : > { %v427_v12 = vmul.f32 %v411_v6, %v313_v59  ;;  %v370_v13 = vadd.f32 %v369_v10, %v279_v54  ;;  %v315_v14 = vadd.f32 %v314_v11, %v284_v57  ;;  %v333_v15 = vpop.f32.mrf.mxu1  ;;  %v428_v17 = vmul.f32 %v412_v8, %v332_v63 }
  0xb2   : > { %v381_v18 = vadd.f32 3.0, %v351_v9  ;;  %v334_v19 = vadd.f32 %v333_v15, %v284_v57 }
  0xb3   : > { %v2505_v21 = vmul.f32 0.16666667, %v427_v12  ;;  %v382_v22 = vadd.f32 3.0, %v370_v13  ;;  %v383_v23 = vadd.f32 3.0, %v315_v14  ;;  %v2509_v25 = vmul.f32 0.16666667, %v428_v17 }
  0xb4   : > { %v397_v26 = vmax.f32 %v381_v18, 0.0  ;;  %v384_v27 = vadd.f32 3.0, %v334_v19 }
  0xb5   : > { %v398_v28 = vmax.f32 %v382_v22, 0.0  ;;  %v399_v29 = vmax.f32 %v383_v23, 0.0  ;;  %466 = vrot.lane.b32.xlu2 %v2505_v21, %s2238_s30  ;;  %v2515_v30 = vmul.f32 %v2491_v55, %v2505_v21  ;;  %550 = vrot.lane.b32.xlu0 %v2509_v25, %s2239_s6  ;;  %v2521_v33 = vmul.f32 %v2491_v55, %v2509_v25 }
  0xb6   : > { %v413_v31 = vmin.f32 %v397_v26, 6.0  ;;  %v400_v32 = vmax.f32 %v384_v27, 0.0  ;;  %v2524_v47 = vpop.permute.xlu1 %673 }
  0xb7   : > { %v414_v34 = vmin.f32 %v398_v28, 6.0  ;;  %v415_v35 = vmin.f32 %v399_v29, 6.0  ;;  %v352_v36 = vpop.f32.mrf.mxu2  ;;  %v2529_v54 = vpop.permute.xlu0 %725 }
  0xb8   : > { %v429_v37 = vmul.f32 %v413_v31, %v351_v9  ;;  %v416_v38 = vmin.f32 %v400_v32, 6.0  ;;  %v353_v39 = vadd.f32 %v352_v36, %v284_v57  ;;  %v371_v40 = vpop.f32.mrf.mxu3  ;;  %v317_v41 = vpop.f32.mrf.mxu0 }
  0xb9   : > { %v430_v42 = vmul.f32 %v414_v34, %v370_v13  ;;  %v431_v43 = vmul.f32 %v415_v35, %v315_v14  ;;  %v372_v44 = vadd.f32 %v371_v40, %v284_v57  ;;  %v318_v45 = vadd.f32 %v317_v41, %v2489_v53  ;;  %v336_v46 = vpop.f32.mrf.mxu1  ;;  %v2553_v9 = vpop.permute.xlu2 %678 }
  0xba   : > { %v2526_v48 = vmul.f32 0.16666667, %v429_v37  ;;  %v432_v49 = vmul.f32 %v416_v38, %v334_v19  ;;  %v385_v50 = vadd.f32 3.0, %v353_v39  ;;  %v337_v51 = vadd.f32 %v336_v46, %v2489_v53  ;;  %3753 = vst [vmem:[#allocation14_spill] sm:$0xff] %v2553_v9 }
  0xbb   : > { %v2531_v58 = vmul.f32 0.16666667, %v430_v42  ;;  %v2533_v59 = vmul.f32 0.16666667, %v431_v43  ;;  %v386_v60 = vadd.f32 3.0, %v372_v44  ;;  %v387_v63 = vadd.f32 3.0, %v318_v45 }
  0xbc   : > { %v2535_v57 = vmul.f32 0.16666667, %v432_v49  ;;  %v401_v1 = vmax.f32 %v385_v50, 0.0  ;;  %v388_v2 = vadd.f32 3.0, %v337_v51  ;;  %v2539_v3 = vmul.f32 %v2491_v55, %v2526_v48 }
  0xbd   : > { %v2543_v5 = vmul.f32 %v2503_v20, %v2533_v59  ;;  %v402_v6 = vmax.f32 %v386_v60, 0.0  ;;  %v403_v7 = vmax.f32 %v387_v63, 0.0  ;;  %490 = vrot.lane.b32.xlu1 %v2531_v58, %s2238_s30  ;;  %474 = vrot.lane.b32.xlu2 %v2509_v25, %s2238_s30  ;;  %v2551_v8 = vmul.f32 %v2491_v55, %v2531_v58 }
  0xbe   : > { %v2557_v10 = vmul.f32 %v2503_v20, %v2535_v57  ;;  %v417_v11 = vmin.f32 %v401_v1, 6.0  ;;  %v404_v12 = vmax.f32 %v388_v2, 0.0  ;;  %482 = vrot.lane.b32.xlu0 %v2526_v48, %s2238_s30  ;;  %v2563_v27 = vpop.permute.xlu1 %932 }
  0xbf   : > { %3752 = vst [vmem:[#allocation13_spill] sm:$0xff] %v2543_v5  ;;  %v418_v13 = vmin.f32 %v402_v6, 6.0  ;;  %v419_v14 = vmin.f32 %v403_v7, 6.0  ;;  %v355_v15 = vpop.f32.mrf.mxu2  ;;  %v974_v31 = vpop.permute.xlu0 %973 }
  0xc0   : > { %v433_v17 = vmul.f32 %v417_v11, %v353_v39  ;;  %v420_v18 = vmin.f32 %v404_v12, 6.0  ;;  %v356_v19 = vadd.f32 %v355_v15, %v2489_v53  ;;  %v374_v55 = vpop.f32.mrf.mxu3  ;;  %v2574_v39 = vmul.f32 %v974_v31, %v2505_v21 }
  0xc1   : > { %v434_v22 = vmul.f32 %v418_v13, %v372_v44  ;;  %v435_v23 = vmul.f32 %v419_v14, %v318_v45  ;;  %v375_v26 = vadd.f32 %v374_v55, %v2489_v53  ;;  %v2581_v41 = vmul.f32 %v974_v31, %v2509_v25  ;;  %v984_v50 = vpop.permute.xlu2 %983 }
  0xc2   : > { %v436_v28 = vmul.f32 %v420_v18, %v337_v51  ;;  %v389_v29 = vadd.f32 3.0, %v356_v19  ;;  %v2565_v32 = vmul.f32 0.16666667, %v433_v17  ;;  %v2592_v44 = vmul.f32 %v974_v31, %v2526_v48 }
  0xc3   : > { %v2567_v34 = vmul.f32 0.16666667, %v435_v23  ;;  %v390_v35 = vadd.f32 3.0, %v375_v26  ;;  %v2569_v36 = vmul.f32 0.16666667, %v434_v22  ;;  %v2597_v46 = vmul.f32 %v974_v31, %v2531_v58  ;;  %v338_v31 = vpop.f32.mrf.mxu1 }
  0xc4   : > { %v2571_v37 = vmul.f32 0.16666667, %v436_v28  ;;  %v405_v38 = vmax.f32 %v389_v29, 0.0  ;;  %v2601_v49 = vmul.f32 %v2503_v20, %v2565_v32 }
  0xc5   : > { %v2578_v53 = vmul.f32 %v2524_v47, %v2567_v34  ;;  %v406_v40 = vmax.f32 %v390_v35, 0.0  ;;  %558 = vrot.lane.b32.xlu1 %v2526_v48, %s2239_s6  ;;  %542 = vrot.lane.b32.xlu2 %v2505_v21, %s2239_s6  ;;  %v2605_v60 = vmul.f32 %v2503_v20, %v2569_v36 }
  0xc6   : > { %v2589_v42 = vmul.f32 %v2524_v47, %v2571_v37  ;;  %v421_v43 = vmin.f32 %v405_v38, 6.0  ;;  %476 = vrot.lane.b32.xlu0 %v2535_v57, %s2238_s30  ;;  %v979_v1 = vpop.permute.xlu1 %978  ;;  %v2608_v2 = vmul.f32 %v984_v50, %v2571_v37  ;;  %v339_v38 = vadd.f32 %v338_v31, %v2493_v56 }
  0xc7   : > { %3754 = vst [vmem:[#allocation15_spill] sm:$0xff] %v2578_v53  ;;  %v422_v45 = vmin.f32 %v406_v40, 6.0  ;;  %v2613_v7 = vmul.f32 %v979_v1, %v2533_v59  ;;  %v2615_v11 = vpop.permute.xlu0 %730  ;;  %v2620_v13 = vmul.f32 %v979_v1, %v2535_v57  ;;  %v2623_v20 = vmul.f32 %v979_v1, %v2565_v32 }
  0xc8   : > { %3755 = vst [vmem:[#allocation16_spill] sm:$0xff] %v2589_v42  ;;  %v437_v51 = vmul.f32 %v421_v43, %v356_v19  ;;  %v2626_v14 = vmul.f32 %v979_v1, %v2569_v36  ;;  %v2646_v19 = vmul.f32 %v984_v50, %v2567_v34  ;;  %v357_v1 = vpop.f32.mrf.mxu2 }
  0xc9   : > { %3756 = vst [vmem:[#allocation17_spill] sm:$0xff] %v2605_v60  ;;  %v438_v63 = vmul.f32 %v422_v45, %v375_v26  ;;  %v319_v26 = vpop.f32.mrf.mxu0  ;;  %v2672_v35 = vpop.permute.xlu2 %735 }
  0xca   : > { %3757 = vst [vmem:[#allocation18_spill] sm:$0xff] %v2608_v2  ;;  %v2610_v6 = vmul.f32 0.16666667, %v437_v51  ;;  %v320_v29 = vadd.f32 %v319_v26, %v2493_v56  ;;  %v376_v45 = vpop.f32.mrf.mxu3  ;;  %v392_v51 = vadd.f32 3.0, %v339_v38 }
  0xcb   : > { %3758 = vst [vmem:[#allocation19_spill] sm:$0xff] %v2613_v7  ;;  %v2617_v12 = vmul.f32 0.16666667, %v438_v63  ;;  %v377_v26 = vadd.f32 %v376_v45, %v2493_v56 }
  0xcc   : > { %3759 = vst [vmem:[#allocation20_spill] sm:$0xff] %v2615_v11  ;;  %v2633_v15 = vmul.f32 %v984_v50, %v2610_v6  ;;  %v2641_v18 = vmul.f32 %v2524_v47, %v2610_v6  ;;  %v391_v40 = vadd.f32 3.0, %v320_v29  ;;  %v408_v31 = vmax.f32 %v392_v51, 0.0 }
  0xcd   : > { %3760 = vst [vmem:[#allocation21_spill] sm:$0xff] %v2620_v13  ;;  %552 = vrot.lane.b32.xlu1 %v2535_v57, %s2239_s6  ;;  %566 = vrot.lane.b32.xlu2 %v2531_v58, %s2239_s6  ;;  %v2637_v17 = vmul.f32 %v2524_v47, %v2617_v12  ;;  %v2649_v55 = vmul.f32 %v984_v50, %v2617_v12 }
  0xce   : > { %3761 = vst [vmem:[#allocation22_spill] sm:$0xff] %v2623_v20  ;;  %544 = vrot.lane.b32.xlu0 %v2533_v59, %s2239_s6  ;;  %v2651_v22 = vpop.permute.xlu1 %942  ;;  %v407_v63 = vmax.f32 %v391_v40, 0.0 }
  0xcf   : > { %3762 = vst [vmem:[#allocation23_spill] sm:$0xff] %v2626_v14  ;;  %v2653_v23 = vpop.permute.xlu0 %1030 }
  0xd0   : > { %3763 = vst [vmem:[#allocation24_spill] sm:$0xff] %v2633_v15 }
  0xd1   : > { %3764 = vst [vmem:[#allocation25_spill] sm:$0xff] %v2637_v17 }
  0xd2   : > { %3765 = vst [vmem:[#allocation26_spill] sm:$0xff] %v2641_v18 }
  0xd3   : > { %3766 = vst [vmem:[#allocation27_spill] sm:$0xff] %v2646_v19  ;;  %v394_v19 = vadd.f32 3.0, %v377_v26 }
  0xd4   : > { %3767 = vst [vmem:[#allocation28_spill] sm:$0xff] %v2649_v55  ;;  %v358_v55 = vadd.f32 %v357_v1, %v2493_v56  ;;  %v424_v56 = vmin.f32 %v408_v31, 6.0 }
  0xd5   : > { %3768 = vst [vmem:[#allocation29_spill] sm:$0xff] %v2651_v22  ;;  %484 = vrot.lane.b32.xlu1 %v2565_v32, %s2238_s30  ;;  %468 = vrot.lane.b32.xlu2 %v2533_v59, %s2238_s30 }
  0xd6   : > { %568 = vrot.lane.b32.xlu0 %v2569_v36, %s2239_s6  ;;  %v2661_v47 = vpop.permute.xlu1 %1035  ;;  %3771 = vst [vmem:[#allocation32_spill] sm:$0xff] %v2672_v35  ;;  %v2687_v35 = vpop.permute.xlu2 %1040  ;;  %v393_v1 = vadd.f32 3.0, %v358_v55 }
  0xd7   : > { %3769 = vst [vmem:[#allocation30_spill] sm:$0xff] %v2661_v47  ;;  %v2663_v28 = vpop.permute.xlu0 %947 }
  0xd8   : > { %3770 = vst [vmem:[#allocation31_spill] sm:$0xff] %v2663_v28 }
  0xd9   : > { %3774 = vst [vmem:[#allocation35_spill] sm:$0xff] %v2687_v35 }
  0xdd   : > { %478 = vrot.lane.b32.xlu1 %v2571_v37, %s2238_s30  ;;  %492 = vrot.lane.b32.xlu2 %v2569_v36, %s2238_s30 }
  0xde   : > { %470 = vrot.lane.b32.xlu0 %v2567_v34, %s2238_s30  ;;  %v2675_v43 = vpop.permute.xlu1 %988 }
  0xdf   : > { %3772 = vst [vmem:[#allocation33_spill] sm:$0xff] %v2675_v43  ;;  %v2677_v50 = vpop.permute.xlu0 %1045  ;;  %v2723_v43 = vpop.permute.xlu2 %782 }
  0xe0   : > { %3773 = vst [vmem:[#allocation34_spill] sm:$0xff] %v2677_v50  ;;  %v423_v50 = vmin.f32 %v407_v63, 6.0  ;;  %v410_v63 = vmax.f32 %v394_v19, 0.0 }
  0xe2   : > { %v439_v28 = vmul.f32 %v423_v50, %v320_v29  ;;  %v426_v16 = vmin.f32 %v410_v63, 6.0 }
  0xe5   : > { %546 = vrot.lane.b32.xlu1 %v2567_v34, %s2239_s6  ;;  %560 = vrot.lane.b32.xlu2 %v2565_v32, %s2239_s6 }
  0xe6   : > { %494 = vrot.lane.b32.xlu0 %v2617_v12, %s2238_s30  ;;  %v2689_v40 = vpop.permute.xlu1 %777 }
  0xe7   : > { %v819_v18 = vpop.permute.xlu0 %818 }
  0xe8   : > { %v2692_v45 = vmul.f32 %v819_v18, %v2505_v21  ;;  %v2695_v17 = vmul.f32 %v819_v18, %v2509_v25  ;;  %v2698_v2 = vmul.f32 %v819_v18, %v2526_v48  ;;  %v2701_v51 = vmul.f32 %v819_v18, %v2531_v58 }
  0xe9   : > { %v440_v21 = vmul.f32 %v424_v56, %v339_v38  ;;  %v409_v25 = vmax.f32 %v393_v1, 0.0  ;;  %v2709_v48 = vmul.f32 0.16666667, %v439_v28 }
  0xeb   : > { %3775 = vst [vmem:[#allocation36_spill] sm:$0xff] %v2709_v48  ;;  %v425_v56 = vmin.f32 %v409_v25, 6.0  ;;  %v1971_v25 = vld [vmem:[%s3719_s2 + $0xb0] sm:$0xff] }
  0xed   : > { %570 = vrot.lane.b32.xlu1 %v2617_v12, %s2239_s6  ;;  %554 = vrot.lane.b32.xlu2 %v2571_v37, %s2239_s6 }
  0xee   : > { %562 = vrot.lane.b32.xlu0 %v2610_v6, %s2239_s6  ;;  %v824_v58 = vpop.permute.xlu1 %823 }
  0xef   : > { %v2712_v18 = vmul.f32 %v824_v58, %v2533_v59  ;;  %v2715_v19 = vmul.f32 %v824_v58, %v2535_v57  ;;  %v2718_v29 = vmul.f32 %v824_v58, %v2565_v32  ;;  %v2721_v50 = vmul.f32 %v824_v58, %v2569_v36  ;;  %v829_v31 = vpop.permute.xlu0 %828  ;;  %v459_v58 = vld [vmem:[#allocation5] sm:$0xf] }
  0xf0   : > { %v2726_v28 = vmul.f32 %v829_v31, %v2567_v34  ;;  %v2729_v38 = vmul.f32 %v829_v31, %v2571_v37  ;;  %v2732_v59 = vmul.f32 %v829_v31, %v2610_v6  ;;  %v2735_v57 = vmul.f32 %v829_v31, %v2617_v12  ;;  %v2749_v12 = vpop.permute.xlu2 %787 }
  0xf1   : > { %v2737_v32 = vmul.f32 0.16666667, %v440_v21  ;;  %v442_v34 = vmul.f32 %v426_v16, %v377_v26  ;;  %v441_v36 = vmul.f32 %v425_v56, %v358_v55  ;;  %v1964_v16 = vld [vmem:[%s3719_s2 + $0x78] sm:$0xff]  ;;  %v498_v26 = vlaneseq }
  0xf2   : > { %3776 = vst [vmem:[#allocation37_spill] sm:$0xff] %v2726_v28  ;;  %v1968_v55 = vld [vmem:[%s3719_s2 + $0x98] sm:$0xff]  ;;  %v2777_v31 = vperm.slane %v459_v58, 1  ;;  %v2240_v56 = vmov 17   ;;  %v2811_v14 = vperm.slane %v459_v58, 2  ;;  %v2813_v22 = vperm.slane %v459_v58, 3 }
  0xf3   : > { %3777 = vst [vmem:[#allocation38_spill] sm:$0xff] %v2729_v38  ;;  %v2745_v37 = vmul.f32 0.16666667, %v442_v34  ;;  %v2747_v1 = vmul.f32 0.16666667, %v441_v36  ;;  %v2771_v21 = vand.u32 127, %v498_v26 }
  0xf4   : > { %3778 = vst [vmem:[#allocation39_spill] sm:$0xff] %v2732_v59 }
  0xf5   : > { %3779 = vst [vmem:[#allocation40_spill] sm:$0xff] %v2735_v57  ;;  %472 = vrot.lane.b32.xlu1 %v2709_v48, %s2238_s30  ;;  %486 = vrot.lane.b32.xlu2 %v2610_v6, %s2238_s30  ;;  %vm500_vm1 = vcmp.lt.s32.totalorder %v2771_v21, 1  ;;  %vm574_vm2 = vcmp.lt.s32.totalorder %v2771_v21, 127  ;;  %vm1112_vm3 = vcmp.lt.s32.totalorder %v2771_v21, 16  ;;  %vm1202_vm4 = vcmp.lt.s32.totalorder %v2771_v21, 112 }
  0xf6   : > { %3780 = vst [vmem:[#allocation41_spill] sm:$0xff] %v2737_v32  ;;  %556 = vrot.lane.b32.xlu0 %v2737_v32, %s2239_s6 }
  0xf7   : > { %3781 = vst [vmem:[#allocation42_spill] sm:$0xff] %v2745_v37 }
  0xf8   : > { %3782 = vst [vmem:[#allocation43_spill] sm:$0xff] %v2747_v1  ;;  %v2764_v6 = vpop.permute.xlu2 %880 }
  0xfd   : > { %496 = vrot.lane.b32.xlu1 %v2745_v37, %s2238_s30  ;;  %480 = vrot.lane.b32.xlu2 %v2737_v32, %s2238_s30 }
  0xfe   : > { %488 = vrot.lane.b32.xlu0 %v2747_v1, %s2238_s30  ;;  %s1846_s30 = scalar_lea.hbm %s3722_s5, %s1995_s23 }
 0x105   : > { %564 = vrot.lane.b32.xlu1 %v2747_v1, %s2239_s6  ;;  %548 = vrot.lane.b32.xlu2 %v2709_v48, %s2239_s6  ;;  %v461_v1 = vld [vmem:[#allocation5 + $0x4] sm:$0xf] }
 0x106   : > { %792 = vperm.xlu0 %2075, %v1964_v16   ;;  %v2790_v32 = vperm.slane %v461_v1, 3  ;;  %v2792_v9 = vperm.slane %v461_v1, 0  ;;  %v2833_v20 = vperm.slane %v461_v1, 1  ;;  %v2835_v38 = vperm.slane %v461_v1, 2 }
 0x10d   : > { %833 = vperm.xlu1 %2076, %v1968_v55   ;;  %572 = vrot.lane.b32.xlu2 %v2745_v37, %s2239_s6  ;;  %v1972_v55 = vld [vmem:[%s3719_s2 + $0xb8] sm:$0xff]  ;;  %s1849_s6 = sshll.u32 %s1846_s30, 4  ;;  %s1850_s6 = int_to_ptr.hbm [resolvable:$true] %s1849_s6 }
 0x10e   : > { %2079 = vset.pattern.permute.xlu0 %v2240_v56  ;;  %s2172_s9 = sshra.s32 %s1850_s6, 4  ;;  %s2173_s9 = int_to_ptr.hbm [resolvable:$true] %s2172_s9 }
 0x10f   : > { %v467_v63 = vpop.permute.xlu2 %466  ;;  %s2174_s10 = scalar_lea.hbm %s2173_s9, 64  ;;  %p2179_p3 = scmp.lt.s32.totalorder %s2173_s9, %s3722_s5 }
 0x110   : > { %p2175_p0 = scmp.ne.s32.totalorder %s2173_s9, %s2174_s10 }
 0x112   : > { %p2176_p1 = pnand %p2175_p0, %p2317_p5 }
 0x114   : > { %p2177_p2 = pneg %p2176_p1 }
 0x115   : > { %885 = vperm.xlu2 %2077, %v1971_v25   ;;  %2080 = vset.pattern.permute.xlu1 %v2240_v56 }
 0x117   : > { %v475_v34 = vpop.permute.xlu2 %474 }
 0x118   : > { %v509_v36 = vsel %vm500_vm1, %v467_v63, %v475_v34 }
 0x119   : > { %v527_v16 = vmul.f32 %v2777_v31, %v509_v36  ;;  %v876_v36 = vpop.permute.xlu1 %875 }
 0x11b   : > { %v796_v26 = vmul.f32 %v2689_v40, %v527_v16  ;;  %v641_v7 = vmul.f32 %v2499_v0, %v527_v16  ;;  %v951_v59 = vmul.f32 %v2563_v27, %v527_v16 }
 0x11d   : > { %890 = vperm.xlu2 %2077, %v1972_v55   ;;  %v2787_v25 = vadd.f32 %v2695_v17, %v796_v26 }
 0x11f   : > { %v543_v37 = vpop.permute.xlu2 %542 }
 0x125   : > { %2078 = vset.pattern.permute.xlu2 %v2240_v56 }
 0x126   : > { %1261 = vperm.xlu2 %2078, %v2368_v4   ;;  %v2809_v4 = vperm.slane %v459_v58, 0 }
 0x127   : > { %v567_v48 = vpop.permute.xlu2 %566  ;;  %v551_v15 = vpop.permute.xlu0 %550 }
 0x128   : > { %v587_v55 = vsel %vm574_vm2, %v567_v48, %v543_v37  ;;  %v583_v17 = vsel %vm574_vm2, %v543_v37, %v551_v15 }
 0x129   : > { %v2800_v26 = vmul.f32 %v2790_v32, %v587_v55  ;;  %v2803_v35 = vmul.f32 %v2792_v9, %v583_v17 }
 0x12b   : > { %v896_v56 = vmul.f32 %v876_v36, %v2800_v26  ;;  %v2807_v42 = vmul.f32 %v876_v36, %v2803_v35 }
 0x12f   : > { %v491_v57 = vpop.permute.xlu1 %490  ;;  %v469_v28 = vpop.permute.xlu2 %468 }
 0x130   : > { %v513_v37 = vsel %vm500_vm1, %v491_v57, %v467_v63  ;;  %v483_v55 = vpop.permute.xlu0 %482 }
 0x131   : > { %v2818_v17 = vmul.f32 %v2809_v4, %v513_v37  ;;  %v501_v11 = vsel %vm500_vm1, %v483_v55, %v491_v57  ;;  %v505_v53 = vsel %vm500_vm1, %v475_v34, %v483_v55 }
 0x132   : > { %v528_v52 = vmul.f32 %v2811_v14, %v505_v53  ;;  %v2826_v58 = vmul.f32 %v2813_v22, %v501_v11  ;;  %v738_v53 = vmul.f32 %v2497_v62, %v2803_v35 }
 0x133   : > { %v640_v60 = vmul.f32 %v2499_v0, %v2818_v17  ;;  %v795_v11 = vmul.f32 %v2689_v40, %v2818_v17 }
 0x134   : > { %v797_v63 = vmul.f32 %v2689_v40, %v528_v52  ;;  %v798_v37 = vmul.f32 %v2689_v40, %v2826_v58 }
 0x135   : > { %v697_v57 = vadd.f32 %v2515_v30, %v640_v60  ;;  %v952_v30 = vmul.f32 %v2563_v27, %v528_v52 }
 0x136   : > { %v854_v34 = vadd.f32 %v2698_v2, %v797_v63  ;;  %v855_v55 = vadd.f32 %v2701_v51, %v798_v37 }
 0x137   : > { %v559_v13 = vpop.permute.xlu1 %558  ;;  %v2846_v5 = vpop.permute.xlu2 %492  ;;  %v754_v1 = vadd.f32 %v738_v53, %v697_v57 }
 0x138   : > { %v575_v60 = vsel %vm574_vm2, %v559_v13, %v567_v48  ;;  %v579_v40 = vsel %vm574_vm2, %v551_v15, %v559_v13  ;;  %v477_v47 = vpop.permute.xlu0 %476  ;;  %v514_v2 = vsel %vm500_vm1, %v2846_v5, %v469_v28  ;;  %v2867_v15 = vadd.f32 %v896_v56, %v855_v55 }
 0x139   : > { %v601_v51 = vmul.f32 %v2833_v20, %v579_v40  ;;  %v602_v16 = vmul.f32 %v2835_v38, %v575_v60  ;;  %v510_v63 = vsel %vm500_vm1, %v469_v28, %v477_v47  ;;  %v2861_v37 = vmul.f32 %v2809_v4, %v514_v2  ;;  %1080 = vrot.lane.b32.xlu0 %v754_v1, %s2241_s16 }
 0x13a   : > { %v2865_v13 = vmul.f32 %v2777_v31, %v510_v63  ;;  %3783 = vst [vmem:[#allocation44_spill] sm:$0xff] %v2867_v15  ;;  %v852_v48 = vadd.f32 %v2692_v45, %v795_v11  ;;  %v1008_v60 = vadd.f32 %v2581_v41, %v951_v59  ;;  %v698_v40 = vadd.f32 %v2521_v33, %v641_v7 }
 0x13b   : > { %v894_v57 = vmul.f32 %v876_v36, %v601_v51  ;;  %v895_v53 = vmul.f32 %v876_v36, %v602_v16  ;;  %v1009_v28 = vadd.f32 %v2592_v44, %v952_v30  ;;  %v799_v2 = vmul.f32 %v2723_v43, %v2861_v37 }
 0x13c   : > { %v1049_v1 = vmul.f32 %v2653_v23, %v601_v51  ;;  %v739_v63 = vmul.f32 %v2497_v62, %v601_v51  ;;  %v1050_v56 = vmul.f32 %v2653_v23, %v602_v16  ;;  %v642_v55 = vmul.f32 %v2499_v0, %v528_v52 }
 0x13d   : > { %v643_v45 = vmul.f32 %v2499_v0, %v2826_v58  ;;  %v800_v41 = vmul.f32 %v2723_v43, %v2865_v13  ;;  %v645_v33 = vmul.f32 %v2495_v61, %v2865_v13  ;;  %v2887_v15 = vadd.f32 %v895_v53, %v854_v34 }
 0x13e   : > { %v1065_v7 = vadd.f32 %v1049_v1, %v1008_v60  ;;  %v755_v59 = vadd.f32 %v739_v63, %v698_v40  ;;  %v1066_v11 = vadd.f32 %v1050_v56, %v1009_v28  ;;  %v2890_v52 = vadd.f32 %v894_v57, %v2787_v25 }
 0x13f   : > { %v553_v44 = vpop.permute.xlu1 %552  ;;  %v561_v36 = vpop.permute.xlu2 %560  ;;  %3784 = vst [vmem:[#allocation45_spill] sm:$0xff] %v2887_v15  ;;  %v2893_v0 = vadd.f32 %v2807_v42, %v852_v48  ;;  %v856_v34 = vadd.f32 %v2712_v18, %v799_v2  ;;  %v857_v42 = vadd.f32 %v2715_v19, %v800_v41  ;;  %v700_v48 = vadd.f32 %v2551_v8, %v643_v45 }
 0x140   : > { %v545_v30 = vpop.permute.xlu0 %544  ;;  %v580_v51 = vsel %vm574_vm2, %v553_v44, %v561_v36  ;;  %1178 = vrot.lane.b32.xlu1 %v1065_v7, %s2242_s17  ;;  %1088 = vrot.lane.b32.xlu2 %v755_v59, %s2241_s16  ;;  %v740_v57 = vmul.f32 %v2497_v62, %v602_v16  ;;  %v702_v2 = vadd.f32 %v2557_v10, %v645_v33 }
 0x141   : > { %v584_v60 = vsel %vm574_vm2, %v545_v30, %v553_v44  ;;  %v2900_v40 = vmul.f32 %v2833_v20, %v580_v51  ;;  %1186 = vrot.lane.b32.xlu0 %v1066_v11, %s2242_s17  ;;  %v741_v1 = vmul.f32 %v2497_v62, %v2800_v26  ;;  %v699_v19 = vadd.f32 %v2539_v3, %v642_v55 }
 0x142   : > { %v2904_v53 = vmul.f32 %v2792_v9, %v584_v60  ;;  %v950_v8 = vmul.f32 %v2563_v27, %v2818_v17  ;;  %v953_v45 = vmul.f32 %v2563_v27, %v2826_v58 }
 0x143   : > { %v898_v25 = vmul.f32 %v2764_v6, %v2900_v40  ;;  %v743_v28 = vmul.f32 %v2529_v54, %v2900_v40  ;;  %v757_v44 = vadd.f32 %v741_v1, %v700_v48  ;;  %v756_v7 = vadd.f32 %v740_v57, %v699_v19 }
 0x144   : > { %v897_v18 = vmul.f32 %v2764_v6, %v2904_v53  ;;  %v1010_v60 = vadd.f32 %v2597_v46, %v953_v45  ;;  %v742_v45 = vmul.f32 %v2529_v54, %v2904_v53 }
 0x145   : > { %v2920_v63 = vadd.f32 %v898_v25, %v857_v42  ;;  %v759_v56 = vadd.f32 %v743_v28, %v702_v2 }
 0x146   : > { %v2924_v16 = vadd.f32 %v897_v18, %v856_v34  ;;  %v1048_v34 = vmul.f32 %v2653_v23, %v2803_v35  ;;  %v644_v35 = vmul.f32 %v2495_v61, %v2861_v37 }
 0x147   : > { %3785 = vst [vmem:[#allocation46_spill] sm:$0xff] %v2920_v63  ;;  %v485_v41 = vpop.permute.xlu1 %484  ;;  %v2928_v10 = vpop.permute.xlu2 %554 }
 0x148   : > { %3786 = vst [vmem:[#allocation47_spill] sm:$0xff] %v2924_v16  ;;  %v502_v62 = vsel %vm500_vm1, %v485_v41, %v2846_v5  ;;  %v506_v3 = vsel %vm500_vm1, %v477_v47, %v485_v41  ;;  %v569_v55 = vpop.permute.xlu0 %568  ;;  %1104 = vrot.lane.b32.xlu1 %v757_v44, %s2241_s16  ;;  %1096 = vrot.lane.b32.xlu2 %v756_v7, %s2241_s16  ;;  %v3789_v41 = vld [vmem:[#allocation30_spill] sm:$0xff]  ;;  %v3818_v16 = vld [vmem:[#allocation27_spill] sm:$0xff] }
 0x149   : > { %v532_v17 = vmul.f32 %v2811_v14, %v506_v3  ;;  %v2937_v33 = vmul.f32 %v2813_v22, %v502_v62  ;;  %v576_v27 = vsel %vm574_vm2, %v561_v36, %v569_v55  ;;  %v588_v58 = vsel %vm574_vm2, %v569_v55, %v545_v30  ;;  %1090 = vrot.lane.b32.xlu0 %v759_v56, %s2241_s16  ;;  %v3790_v62 = vld [vmem:[#allocation13_spill] sm:$0xff] }
 0x14a   : > { %v606_v5 = vmul.f32 %v2835_v38, %v576_v27  ;;  %v1007_v47 = vadd.f32 %v2574_v39, %v950_v8  ;;  %v2954_v36 = vmul.f32 %v2790_v32, %v588_v58  ;;  %v1051_v39 = vmul.f32 %v2653_v23, %v2800_v26  ;;  %v3791_v55 = vld [vmem:[#allocation21_spill] sm:$0xff]  ;;  %v3792_v58 = vld [vmem:[#allocation39_spill] sm:$0xff] }
 0x14b   : > { %v646_v59 = vmul.f32 %v2495_v61, %v532_v17  ;;  %v801_v11 = vmul.f32 %v2723_v43, %v532_v17  ;;  %v802_v51 = vmul.f32 %v2723_v43, %v2937_v33  ;;  %v955_v26 = vmul.f32 %v2507_v24, %v2865_v13 }
 0x14c   : > { %v899_v30 = vmul.f32 %v2764_v6, %v606_v5  ;;  %v744_v25 = vmul.f32 %v2529_v54, %v606_v5  ;;  %v900_v43 = vmul.f32 %v2764_v6, %v2954_v36  ;;  %v1064_v48 = vadd.f32 %v1048_v34, %v1007_v47 }
 0x14d   : > { %v703_v42 = vadd.f32 %v2601_v49, %v646_v59  ;;  %v1067_v57 = vadd.f32 %v1051_v39, %v1010_v60  ;;  %v858_v2 = vadd.f32 %v2718_v29, %v801_v11  ;;  %v859_v1 = vadd.f32 %v2721_v50, %v802_v51  ;;  %v3793_v59 = vld [vmem:[#allocation19_spill] sm:$0xff]  ;;  %v3794_v51 = vld [vmem:[#allocation38_spill] sm:$0xff] }
 0x14e   : > { %v954_v50 = vmul.f32 %v2507_v24, %v2861_v37  ;;  %v1053_v44 = vmul.f32 %v3789_v41, %v2900_v40  ;;  %v1052_v7 = vmul.f32 %v3789_v41, %v2904_v53  ;;  %v701_v3 = vadd.f32 %v3790_v62, %v644_v35  ;;  %v3800_v62 = vld [vmem:[#allocation37_spill] sm:$0xff] }
 0x14f   : > { %v479_v46 = vpop.permute.xlu1 %478  ;;  %v487_v28 = vpop.permute.xlu2 %486  ;;  %v760_v18 = vadd.f32 %v744_v25, %v703_v42  ;;  %v2986_v8 = vadd.f32 %v899_v30, %v858_v2  ;;  %v2988_v13 = vadd.f32 %v900_v43, %v859_v1  ;;  %v1012_v27 = vadd.f32 %v3791_v55, %v955_v26  ;;  %v3795_v2 = vld [vmem:[#allocation22_spill] sm:$0xff] }
 0x150   : > { %v471_v23 = vpop.permute.xlu0 %470  ;;  %v507_v49 = vsel %vm500_vm1, %v479_v46, %v487_v28  ;;  %1194 = vrot.lane.b32.xlu1 %v1067_v57, %s2242_s17  ;;  %1170 = vrot.lane.b32.xlu2 %v1064_v48, %s2242_s17  ;;  %v1011_v11 = vadd.f32 %v3793_v59, %v954_v50  ;;  %v647_v40 = vmul.f32 %v2495_v61, %v2937_v33 }
 0x151   : > { %v511_v6 = vsel %vm500_vm1, %v471_v23, %v479_v46  ;;  %v2978_v29 = vmul.f32 %v2811_v14, %v507_v49  ;;  %1098 = vrot.lane.b32.xlu0 %v760_v18, %s2241_s16  ;;  %3787 = vst [vmem:[#allocation48_spill] sm:$0xff] %v2986_v8  ;;  %v956_v30 = vmul.f32 %v2507_v24, %v532_v17  ;;  %v3796_v49 = vld [vmem:[#allocation17_spill] sm:$0xff] }
 0x152   : > { %v2983_v19 = vmul.f32 %v2777_v31, %v511_v6  ;;  %3788 = vst [vmem:[#allocation49_spill] sm:$0xff] %v2988_v13  ;;  %v758_v39 = vadd.f32 %v742_v45, %v701_v3  ;;  %v1069_v53 = vadd.f32 %v1053_v44, %v1012_v27  ;;  %v1068_v48 = vadd.f32 %v1052_v7, %v1011_v11  ;;  %v3798_v45 = vld [vmem:[#allocation15_spill] sm:$0xff] }
 0x153   : > { %v805_v56 = vmul.f32 %v2749_v12, %v2978_v29  ;;  %v1013_v1 = vadd.f32 %v3795_v2, %v956_v30  ;;  %v1054_v35 = vmul.f32 %v3789_v41, %v606_v5  ;;  %v704_v26 = vadd.f32 %v3796_v49, %v647_v40  ;;  %v3801_v5 = vld [vmem:[#allocation40_spill] sm:$0xff] }
 0x154   : > { %v804_v37 = vmul.f32 %v2749_v12, %v2983_v19  ;;  %v3804_v2 = vld [vmem:[#allocation16_spill] sm:$0xff] }
 0x155   : > { %v3003_v47 = vadd.f32 %v3792_v58, %v805_v56  ;;  %v1070_v58 = vadd.f32 %v1054_v35, %v1013_v1  ;;  %v3805_v35 = vld [vmem:[#allocation35_spill] sm:$0xff] }
 0x156   : > { %v3007_v60 = vadd.f32 %v3794_v51, %v804_v37  ;;  %v3799_v37 = vld [vmem:[#allocation20_spill] sm:$0xff] }
 0x157   : > { %v547_v34 = vpop.permute.xlu1 %546  ;;  %v3012_v42 = vpop.permute.xlu2 %480 }
 0x158   : > { %v585_v25 = vsel %vm574_vm2, %v547_v34, %v2928_v10  ;;  %v495_v43 = vpop.permute.xlu0 %494  ;;  %1082 = vrot.lane.b32.xlu1 %v758_v39, %s2241_s16  ;;  %1180 = vrot.lane.b32.xlu2 %v1069_v53, %s2242_s17 }
 0x159   : > { %v503_v61 = vsel %vm500_vm1, %v487_v28, %v495_v43  ;;  %v515_v17 = vsel %vm500_vm1, %v495_v43, %v471_v23  ;;  %v3024_v46 = vmul.f32 %v2792_v9, %v585_v25  ;;  %1172 = vrot.lane.b32.xlu0 %v1068_v48, %s2242_s17  ;;  %v745_v28 = vmul.f32 %v2529_v54, %v2954_v36  ;;  %v3797_v23 = vld [vmem:[#allocation11_spill] sm:$0xff] }
 0x15a   : > { %v534_v57 = vmul.f32 %v2809_v4, %v515_v17  ;;  %v3028_v18 = vmul.f32 %v2813_v22, %v503_v61  ;;  %v957_v54 = vmul.f32 %v2507_v24, %v2937_v33  ;;  %v3802_v33 = vld [vmem:[#allocation29_spill] sm:$0xff]  ;;  %v3803_v43 = vld [vmem:[#allocation23_spill] sm:$0xff]  ;;  %v1055_v61 = vmul.f32 %v3789_v41, %v2954_v36 }
 0x15b   : > { %v746_v7 = vmul.f32 %v3799_v37, %v3024_v46  ;;  %v761_v59 = vadd.f32 %v745_v28, %v704_v26  ;;  %v960_v39 = vmul.f32 %v3802_v33, %v2978_v29  ;;  %v3806_v28 = vld [vmem:[#allocation24_spill] sm:$0xff]  ;;  %v1056_v15 = vmul.f32 %v3805_v35, %v3024_v46 }
 0x15c   : > { %v648_v6 = vmul.f32 %v3797_v23, %v534_v57  ;;  %v803_v50 = vmul.f32 %v2749_v12, %v534_v57  ;;  %v806_v56 = vmul.f32 %v2749_v12, %v3028_v18  ;;  %v649_v12 = vmul.f32 %v3797_v23, %v2983_v19 }
 0x15d   : > { %v1014_v48 = vadd.f32 %v3803_v43, %v957_v54  ;;  %v3809_v54 = vld [vmem:[#allocation41_spill] sm:$0xff] }
 0x15e   : > { %v705_v44 = vadd.f32 %v3798_v45, %v648_v6  ;;  %v3044_v3 = vadd.f32 %v3800_v62, %v803_v50  ;;  %v3047_v55 = vadd.f32 %v3801_v5, %v806_v56  ;;  %v706_v1 = vadd.f32 %v3804_v2, %v649_v12  ;;  %v3808_v62 = vld [vmem:[#allocation14_spill] sm:$0xff] }
 0x15f   : > { %v571_v27 = vpop.permute.xlu1 %570  ;;  %v549_v11 = vpop.permute.xlu2 %548  ;;  %v1017_v6 = vadd.f32 %v3806_v28, %v960_v39  ;;  %v1071_v45 = vadd.f32 %v1055_v61, %v1014_v48  ;;  %v3813_v48 = vld [vmem:[#allocation31_spill] sm:$0xff]  ;;  %v3816_v28 = vld [vmem:[#allocation25_spill] sm:$0xff] }
 0x160   : > { %v563_v51 = vpop.permute.xlu0 %562  ;;  %v762_v40 = vadd.f32 %v746_v7, %v705_v44  ;;  %1188 = vrot.lane.b32.xlu1 %v1070_v58, %s2242_s17  ;;  %1106 = vrot.lane.b32.xlu2 %v761_v59, %s2241_s16  ;;  %v589_v17 = vsel %vm574_vm2, %v571_v27, %v547_v34  ;;  %v3807_v7 = vld [vmem:[#allocation36_spill] sm:$0xff]  ;;  %v959_v58 = vmul.f32 %v3802_v33, %v2983_v19  ;;  %v3811_v19 = vld [vmem:[#allocation43_spill] sm:$0xff] }
 0x161   : > { %v577_v30 = vsel %vm574_vm2, %v563_v51, %v571_v27  ;;  %v581_v24 = vsel %vm574_vm2, %v2928_v10, %v563_v51  ;;  %v3075_v50 = vmul.f32 %v2790_v32, %v589_v17  ;;  %v693_v5 = vmul.f32 %v3808_v62, %v3807_v7  ;;  %v3810_v51 = vld [vmem:[#allocation33_spill] sm:$0xff] }
 0x162   : > { %v609_v53 = vmul.f32 %v2833_v20, %v581_v24  ;;  %v610_v25 = vmul.f32 %v2835_v38, %v577_v30  ;;  %1084 = vrot.lane.b32.xlu0 %v762_v40, %s2241_s16  ;;  %v694_v27 = vmul.f32 %v3808_v62, %v3809_v54  ;;  %v651_v59 = vmul.f32 %v3797_v23, %v3028_v18 }
 0x163   : > { %v1004_v40 = vmul.f32 %v3810_v51, %v3809_v54  ;;  %v650_v30 = vmul.f32 %v3797_v23, %v2978_v29  ;;  %v958_v24 = vmul.f32 %v3802_v33, %v534_v57  ;;  %v695_v39 = vmul.f32 %v3808_v62, %v3811_v19 }
 0x164   : > { %v747_v10 = vmul.f32 %v3799_v37, %v609_v53  ;;  %v1058_v49 = vmul.f32 %v3805_v35, %v610_v25  ;;  %v1057_v17 = vmul.f32 %v3805_v35, %v609_v53  ;;  %v749_v2 = vmul.f32 %v3799_v37, %v3075_v50 }
 0x165   : > { %v1003_v29 = vmul.f32 %v3810_v51, %v3807_v7  ;;  %v1005_v57 = vmul.f32 %v3810_v51, %v3811_v19  ;;  %v748_v63 = vmul.f32 %v3799_v37, %v610_v25  ;;  %v1015_v8 = vadd.f32 %v3818_v16, %v958_v24 }
 0x166   : > { %v763_v26 = vadd.f32 %v747_v10, %v706_v1  ;;  %v1074_v34 = vadd.f32 %v1058_v49, %v1017_v6  ;;  %v3814_v1 = vld [vmem:[#allocation42_spill] sm:$0xff]  ;;  %v708_v6 = vadd.f32 %v3816_v28, %v651_v59 }
 0x167   : > { %v473_v56 = vpop.permute.xlu1 %472  ;;  %v3077_v44 = vpop.permute.xlu2 %572  ;;  %v3121_v10 = vmul.f32 %v3808_v62, %v3814_v1  ;;  %v3815_v49 = vld [vmem:[#allocation18_spill] sm:$0xff] }
 0x168   : > { %v512_v36 = vsel %vm500_vm1, %v473_v56, %v3012_v42  ;;  %v3082_v41 = vpop.permute.xlu0 %556  ;;  %1196 = vrot.lane.b32.xlu2 %v1071_v45, %s2242_s17  ;;  %1092 = vrot.lane.b32.xlu1 %v763_v26, %s2241_s16  ;;  %v1016_v26 = vadd.f32 %v3815_v49, %v959_v58  ;;  %v590_v58 = vsel %vm574_vm2, %v3077_v44, %v549_v11 }
 0x169   : > { %v3093_v12 = vmul.f32 %v2777_v31, %v512_v36  ;;  %v3812_v31 = vld [vmem:[#allocation12_spill] sm:$0xff]  ;;  %v586_v23 = vsel %vm574_vm2, %v549_v11, %v3082_v41 }
 0x16a   : > { %1190 = vrot.lane.b32.xlu0 %v1074_v34, %s2242_s17  ;;  %v3817_v34 = vld [vmem:[#allocation26_spill] sm:$0xff]  ;;  %v612_v62 = vmul.f32 %v2792_v9, %v586_v23 }
 0x16b   : > { %v653_v43 = vmul.f32 %v3812_v31, %v3093_v12  ;;  %v963_v61 = vmul.f32 %v3813_v48, %v3093_v12  ;;  %v707_v13 = vadd.f32 %v3817_v34, %v650_v30  ;;  %v3820_v34 = vld [vmem:[#allocation34_spill] sm:$0xff] }
 0x16d   : > { %v3125_v45 = vadd.f32 %v1004_v40, %v963_v61  ;;  %v3127_v36 = vadd.f32 %v694_v27, %v653_v43  ;;  %v1073_v40 = vadd.f32 %v1057_v17, %v1016_v26  ;;  %v765_v61 = vadd.f32 %v749_v2, %v708_v6  ;;  %v3819_v26 = vld [vmem:[#allocation32_spill] sm:$0xff] }
 0x16f   : > { %v497_v59 = vpop.permute.xlu1 %496  ;;  %v886_v27 = vpop.permute.xlu2 %885 }
 0x170   : > { %v516_v30 = vsel %vm500_vm1, %v497_v59, %v473_v56  ;;  %v489_v43 = vpop.permute.xlu0 %488  ;;  %v901_v37 = vmul.f32 %v886_v27, %v3024_v46  ;;  %v902_v16 = vmul.f32 %v886_v27, %v609_v53  ;;  %v903_v24 = vmul.f32 %v886_v27, %v610_v25  ;;  %1182 = vrot.lane.b32.xlu2 %v1073_v40, %s2242_s17 }
 0x171   : > { %v538_v49 = vmul.f32 %v2809_v4, %v516_v30  ;;  %v504_v9 = vsel %vm500_vm1, %v489_v43, %v497_v59  ;;  %v508_v11 = vsel %vm500_vm1, %v3012_v42, %v489_v43  ;;  %1108 = vrot.lane.b32.xlu1 %v765_v61, %s2241_s16  ;;  %v904_v46 = vmul.f32 %v886_v27, %v3075_v50 }
 0x172   : > { %v540_v56 = vmul.f32 %v2811_v14, %v508_v11  ;;  %v3151_v17 = vmul.f32 %v2813_v22, %v504_v9  ;;  %v3155_v4 = vadd.f32 %v902_v16, %v3007_v60  ;;  %v3160_v2 = vadd.f32 %v903_v24, %v3003_v47 }
 0x173   : > { %v652_v53 = vmul.f32 %v3812_v31, %v538_v49  ;;  %v962_v25 = vmul.f32 %v3813_v48, %v538_v49  ;;  %v3163_v42 = vadd.f32 %v901_v37, %v3044_v3  ;;  %v961_v14 = vmul.f32 %v3802_v33, %v3028_v18 }
 0x174   : > { %v654_v22 = vmul.f32 %v3812_v31, %v540_v56  ;;  %v964_v23 = vmul.f32 %v3813_v48, %v540_v56  ;;  %v750_v60 = vmul.f32 %v3819_v26, %v612_v62  ;;  %v1060_v59 = vmul.f32 %v3820_v34, %v612_v62 }
 0x175   : > { %v709_v28 = vadd.f32 %v693_v5, %v652_v53  ;;  %v1019_v6 = vadd.f32 %v1003_v29, %v962_v25  ;;  %v3172_v40 = vadd.f32 %v904_v46, %v3047_v55  ;;  %v3175_v47 = vmul.f32 %v2790_v32, %v590_v58 }
 0x176   : > { %v1072_v3 = vadd.f32 %v1056_v15, %v1015_v8  ;;  %v711_v61 = vadd.f32 %v695_v39, %v654_v22  ;;  %v1021_v27 = vadd.f32 %v1005_v57, %v964_v23  ;;  %v655_v18 = vmul.f32 %v3812_v31, %v3151_v17 }
 0x177   : > { %v565_v33 = vpop.permute.xlu1 %564  ;;  %v764_v30 = vadd.f32 %v748_v63, %v707_v13  ;;  %v891_v43 = vpop.permute.xlu2 %890  ;;  %v766_v37 = vadd.f32 %v750_v60, %v709_v28  ;;  %v1076_v5 = vadd.f32 %v1060_v59, %v1019_v6  ;;  %v753_v25 = vmul.f32 %v3819_v26, %v3175_v47  ;;  %v3223_v59 = vld [vmem:[%s3718_s1 + $0x10] sm:$0xff] }
 0x178   : > { %v578_v29 = vsel %vm574_vm2, %v565_v33, %v3077_v44  ;;  %v582_v32 = vsel %vm574_vm2, %v3082_v41, %v565_v33  ;;  %v793_v55 = vpop.permute.xlu0 %792  ;;  %v905_v15 = vmul.f32 %v891_v43, %v612_v62  ;;  %v908_v8 = vmul.f32 %v891_v43, %v3175_v47 }
 0x179   : > { %v613_v39 = vmul.f32 %v2833_v20, %v582_v32  ;;  %v614_v31 = vmul.f32 %v2835_v38, %v578_v29  ;;  %1100 = vrot.lane.b32.xlu2 %v764_v30, %s2241_s16  ;;  %v807_v63 = vmul.f32 %v793_v55, %v538_v49  ;;  %v808_v13 = vmul.f32 %v793_v55, %v3093_v12  ;;  %v3821_v49 = vld [vmem:[#allocation28_spill] sm:$0xff]  ;;  %v465_v29 = vld [vmem:[#allocation5 + $0xc] sm:$0xf] }
 0x17a   : > { %v809_v57 = vmul.f32 %v793_v55, %v540_v56  ;;  %v810_v44 = vmul.f32 %v793_v55, %v3151_v17  ;;  %1174 = vrot.lane.b32.xlu1 %v1072_v3, %s2242_s17  ;;  %1086 = vrot.lane.b32.xlu0 %v766_v37, %s2241_s16  ;;  %v1059_v41 = vmul.f32 %v3805_v35, %v3075_v50  ;;  %v3257_v55 = vperm.slane %v465_v29, 1 }
 0x17b   : > { %v906_v62 = vmul.f32 %v891_v43, %v613_v39  ;;  %v907_v58 = vmul.f32 %v891_v43, %v614_v31  ;;  %v1061_v20 = vmul.f32 %v3820_v34, %v613_v39  ;;  %v751_v38 = vmul.f32 %v3819_v26, %v613_v39 }
 0x17c   : > { %v752_v16 = vmul.f32 %v3819_v26, %v614_v31  ;;  %v1062_v12 = vmul.f32 %v3820_v34, %v614_v31  ;;  %v1018_v9 = vadd.f32 %v3821_v49, %v961_v14  ;;  %v712_v11 = vadd.f32 %v3121_v10, %v655_v18 }
 0x17d   : > { %v1077_v24 = vadd.f32 %v1061_v20, %v3125_v45  ;;  %v767_v56 = vadd.f32 %v751_v38, %v3127_v36  ;;  %v965_v3 = vmul.f32 %v3813_v48, %v3151_v17  ;;  %v1063_v33 = vmul.f32 %v3820_v34, %v3175_v47  ;;  %v3242_v48 = vld [vmem:[%s3718_s1 + $0x8] sm:$0xff]  ;;  %v463_v47 = vld [vmem:[#allocation5 + $0x8] sm:$0xf] }
 0x17e   : > { %v768_v46 = vadd.f32 %v752_v16, %v711_v61  ;;  %v1078_v35 = vadd.f32 %v1062_v12, %v1021_v27  ;;  %v1075_v53 = vadd.f32 %v1059_v41, %v1018_v9  ;;  %v769_v10 = vadd.f32 %v753_v25, %v712_v11 }
 0x17f   : > { %v834_v50 = vpop.permute.xlu1 %833  ;;  %v1006_v27 = vmul.f32 %v3810_v51, %v3814_v1  ;;  %v3248_v51 = vld [vmem:[%s3718_s1 + $0x18] sm:$0xff]  ;;  %v3252_v37 = vperm.slane %v463_v47, 1  ;;  %v3271_v20 = vperm.slane %v463_v47, 2 }
 0x180   : > { %v848_v22 = vmul.f32 %v834_v50, %v3807_v7  ;;  %v849_v23 = vmul.f32 %v834_v50, %v3809_v54  ;;  %v850_v60 = vmul.f32 %v834_v50, %v3811_v19  ;;  %v851_v45 = vmul.f32 %v834_v50, %v3814_v1  ;;  %v3230_v61 = vpop.permute.xlu2 %1261 }
 0x181   : > { %1184 = vrot.lane.b32.xlu2 %v1077_v24, %s2242_s17  ;;  %v1022_v18 = vadd.f32 %v1006_v27, %v965_v3  ;;  %v3279_v24 = vperm.slane %v463_v47, 3  ;;  %v3823_v3 = vld [vmem:[#allocation44_spill] sm:$0xff] }
 0x182   : > { %v864_v14 = vadd.f32 %v848_v22, %v807_v63  ;;  %v865_v36 = vadd.f32 %v849_v23, %v808_v13  ;;  %v866_v28 = vadd.f32 %v850_v60, %v809_v57  ;;  %v867_v6 = vadd.f32 %v851_v45, %v810_v44  ;;  %1198 = vrot.lane.b32.xlu1 %v1075_v53, %s2242_s17 }
 0x183   : > { %1110 = vrot.lane.b32.xlu0 %v769_v10, %s2241_s16  ;;  %v1079_v30 = vadd.f32 %v1063_v33, %v1022_v18  ;;  %v3266_v44 = vperm.slane %v463_v47, 0  ;;  %v3290_v22 = vperm.slane %v465_v29, 2  ;;  %v3292_v23 = vperm.slane %v465_v29, 3 }
 0x184   : > { %v3212_v26 = vadd.f32 %v905_v15, %v864_v14  ;;  %v3214_v7 = vadd.f32 %v906_v62, %v865_v36  ;;  %v3216_v54 = vadd.f32 %v907_v58, %v866_v28  ;;  %v3218_v19 = vadd.f32 %v908_v8, %v867_v6  ;;  %v3822_v14 = vld [vmem:[#allocation45_spill] sm:$0xff] }
 0x185   : > { %v3269_v62 = vperm.slane %v465_v29, 0 }
 0x189   : > { %1269 = vperm.xlu2 %2078, %v3223_v59  }
 0x18a   : > { %1094 = vrot.lane.b32.xlu1 %v767_v56, %s2241_s16 }
 0x18b   : > { %1102 = vrot.lane.b32.xlu0 %v768_v46, %s2241_s16  ;;  %s1942_s16 = sshll.u32 %s249_s15, 6 }
 0x192   : > { %1176 = vrot.lane.b32.xlu1 %v1076_v5, %s2242_s17 }
 0x193   : > { %1192 = vrot.lane.b32.xlu0 %v1078_v35, %s2242_s17 }
 0x19a   : > { %1200 = vrot.lane.b32.xlu1 %v1079_v30, %s2242_s17  ;;  %v1089_v43 = vpop.permute.xlu2 %1088 }
 0x19b   : > { %1265 = vperm.xlu0 %2079, %v3242_v48  }
 0x1a2   : > { %1273 = vperm.xlu1 %2080, %v3248_v51   ;;  %v1097_v1 = vpop.permute.xlu2 %1096 }
 0x1aa   : > { %v1171_v17 = vpop.permute.xlu2 %1170 }
 0x1ab   : > { %v1081_v34 = vpop.permute.xlu0 %1080 }
 0x1ac   : > { %v1121_v5 = vsel %vm1112_vm3, %v1081_v34, %v1089_v43 }
 0x1ad   : > { %v1139_v32 = vmul.f32 %v3252_v37, %v1121_v5 }
 0x1af   : > { %v1155_v63 = vadd.f32 %v1139_v32, %v2890_v52  ;;  %v1117_v52 = vsel %vm1112_vm3, %v1089_v43, %v1097_v1 }
 0x1b0   : > { %v1140_v50 = vmul.f32 %v3271_v20, %v1117_v52  ;;  %v1559_v52 = vld [vmem:[#allocation5 + $0x14] sm:$0xf] }
 0x1b2   : > { %v1179_v15 = vpop.permute.xlu1 %1178  ;;  %v3260_v8 = vpop.permute.xlu2 %1180  ;;  %v1156_v36 = vadd.f32 %v1140_v50, %v3822_v14  ;;  %v3825_v14 = vld [vmem:[#allocation47_spill] sm:$0xff] }
 0x1b3   : > { %v1187_v39 = vpop.permute.xlu0 %1186  ;;  %v1211_v38 = vsel %vm1202_vm4, %v1171_v17, %v1179_v15 }
 0x1b4   : > { %v1207_v31 = vsel %vm1202_vm4, %v1179_v15, %v1187_v39  ;;  %v1228_v46 = vmul.f32 %v3269_v62, %v1211_v38 }
 0x1b5   : > { %v1229_v13 = vmul.f32 %v3257_v55, %v1207_v31  ;;  %v3824_v31 = vld [vmem:[#allocation48_spill] sm:$0xff] }
 0x1b7   : > { %v1245_v57 = vadd.f32 %v1229_v13, %v1155_v63 }
 0x1b9   : > { %v1277_v41 = vadd.f32 %v3230_v61, %v1245_v57 }
 0x1ba   : > { %v1105_v58 = vpop.permute.xlu1 %1104  ;;  %v3284_v56 = vpop.permute.xlu2 %1106 }
 0x1bb   : > { %v1125_v16 = vsel %vm1112_vm3, %v1105_v58, %v1081_v34  ;;  %v1091_v12 = vpop.permute.xlu0 %1090  ;;  %v1293_v9 = vadd.f32 3.0, %v1277_v41  ;;  %v1113_v11 = vsel %vm1112_vm3, %v1097_v1, %v1105_v58 }
 0x1bc   : > { %v1138_v49 = vmul.f32 %v3266_v44, %v1125_v16  ;;  %v1141_v53 = vmul.f32 %v3279_v24, %v1113_v11 }
 0x1bd   : > { %v1309_v60 = vmax.f32 %v1293_v9, 0.0 }
 0x1be   : > { %v1154_v35 = vadd.f32 %v1138_v49, %v2893_v0  ;;  %v1157_v27 = vadd.f32 %v1141_v53, %v3823_v3  ;;  %v1374_v49 = vld [vmem:[#allocation5 + $0x10] sm:$0xf] }
 0x1bf   : > { %v1325_v43 = vmin.f32 %v1309_v60, 6.0  ;;  %v3325_v50 = vperm.slane %v1374_v49, 0  ;;  %v3327_v60 = vperm.slane %v1559_v52, 1 }
 0x1c0   : > { %v1244_v25 = vadd.f32 %v1228_v46, %v1154_v35  ;;  %v3321_v46 = vperm.slane %v1559_v52, 0 }
 0x1c1   : > { %v1341_v13 = vmul.f32 %v1325_v43, %v1277_v41 }
 0x1c2   : > { %v1276_v45 = vadd.f32 %v3230_v61, %v1244_v25  ;;  %v1195_v10 = vpop.permute.xlu1 %1194 }
 0x1c3   : > { %v1203_v28 = vsel %vm1202_vm4, %v1187_v39, %v1195_v10  ;;  %v1215_v0 = vsel %vm1202_vm4, %v1195_v10, %v1171_v17  ;;  %v3300_v6 = vpop.permute.xlu0 %1098  ;;  %v3309_v17 = vpop.permute.xlu2 %1196 }
 0x1c4   : > { %v1292_v18 = vadd.f32 3.0, %v1276_v45  ;;  %v1230_v33 = vmul.f32 %v3290_v22, %v1203_v28  ;;  %v1231_v30 = vmul.f32 %v3292_v23, %v1215_v0  ;;  %v1118_v1 = vsel %vm1112_vm3, %v1091_v12, %v3300_v6  ;;  %v3826_v28 = vld [vmem:[#allocation46_spill] sm:$0xff] }
 0x1c5   : > { %v1144_v29 = vmul.f32 %v3271_v20, %v1118_v1 }
 0x1c6   : > { %v1308_v34 = vmax.f32 %v1292_v18, 0.0  ;;  %v1246_v47 = vadd.f32 %v1230_v33, %v1156_v36  ;;  %v1247_v5 = vadd.f32 %v1231_v30, %v1157_v27  ;;  %v3337_v27 = vperm.slane %v1559_v52, 2 }
 0x1c7   : > { %v3314_v63 = vadd.f32 %v1144_v29, %v3824_v31  ;;  %v3342_v30 = vperm.slane %v1374_v49, 2 }
 0x1c8   : > { %v1324_v32 = vmin.f32 %v1308_v34, 6.0  ;;  %v1278_v15 = vadd.f32 %v3230_v61, %v1246_v47  ;;  %v1279_v39 = vadd.f32 %v3230_v61, %v1247_v5  ;;  %v3349_v5 = vperm.slane %v1559_v52, 3 }
 0x1ca   : > { %v1294_v57 = vadd.f32 3.0, %v1278_v15  ;;  %v1295_v58 = vadd.f32 3.0, %v1279_v39  ;;  %v1083_v38 = vpop.permute.xlu1 %1082  ;;  %v1340_v16 = vmul.f32 %v1324_v32, %v1276_v45  ;;  %v3329_v45 = vperm.slane %v1374_v49, 1 }
 0x1cb   : > { %v1122_v9 = vsel %vm1112_vm3, %v1083_v38, %v1091_v12  ;;  %v1126_v11 = vsel %vm1112_vm3, %v3284_v56, %v1083_v38  ;;  %v1357_v12 = vmul.f32 0.16666667, %v1341_v13  ;;  %v1183_v1 = vpop.permute.xlu2 %1182  ;;  %v3347_v34 = vpop.permute.xlu0 %1172 }
 0x1cc   : > { %v1310_v61 = vmax.f32 %v1294_v57, 0.0  ;;  %v1142_v35 = vmul.f32 %v3266_v44, %v1126_v11  ;;  %v1143_v41 = vmul.f32 %v3252_v37, %v1122_v9  ;;  %v1311_v53 = vmax.f32 %v1295_v58, 0.0 }
 0x1cd   : > { %v1356_v25 = vmul.f32 0.16666667, %v1340_v16  ;;  %v3354_v31 = vmul.f32 %v3327_v60, %v1357_v12  ;;  %v3359_v13 = vmul.f32 %v3329_v45, %v1357_v12 }
 0x1ce   : > { %v1326_v10 = vmin.f32 %v1310_v61, 6.0  ;;  %v3332_v36 = vadd.f32 %v1142_v35, %v3825_v14  ;;  %v3335_v0 = vadd.f32 %v1143_v41, %v3826_v28  ;;  %v1327_v3 = vmin.f32 %v1311_v53, 6.0 }
 0x1cf   : > { %v3340_v33 = vmul.f32 %v3321_v46, %v1356_v25  ;;  %v3345_v43 = vmul.f32 %v3325_v50, %v1356_v25  ;;  %3828 = vst [vmem:[#allocation13_spill] sm:$0xff] %v3359_v13 }
 0x1d0   : > { %v1342_v18 = vmul.f32 %v1326_v10, %v1278_v15  ;;  %v1343_v47 = vmul.f32 %v1327_v3, %v1279_v39  ;;  %v3356_v15 = vperm.slane %v1374_v49, 3 }
 0x1d1   : > { %3827 = vst [vmem:[#allocation30_spill] sm:$0xff] %v3345_v43  ;;  %v1585_v39 = vadd.f32 %v3354_v31, %v3340_v33  ;;  %v1400_v16 = vadd.f32 %v3359_v13, %v3345_v43 }
 0x1d2   : > { %v3351_v29 = vpop.permute.xlu1 %1188  ;;  %v1358_v32 = vmul.f32 0.16666667, %v1342_v18  ;;  %v1359_v57 = vmul.f32 0.16666667, %v1343_v47 }
 0x1d3   : > { %v1101_v25 = vpop.permute.xlu2 %1100 }
 0x1d4   : > { %v3362_v58 = vmul.f32 %v3337_v27, %v1358_v32  ;;  %v3367_v38 = vmul.f32 %v3342_v30, %v1358_v32  ;;  %v3372_v52 = vmul.f32 %v3349_v5, %v1359_v57  ;;  %v3376_v9 = vmul.f32 %v3356_v15, %v1359_v57  ;;  %v1085_v41 = vpop.permute.xlu0 %1084 }
 0x1d6   : > { %3829 = vst [vmem:[#allocation21_spill] sm:$0xff] %v3367_v38  ;;  %v1586_v49 = vadd.f32 %v1585_v39, %v3362_v58  ;;  %v1401_v11 = vadd.f32 %v1400_v16, %v3367_v38 }
 0x1d7   : > { %3830 = vst [vmem:[#allocation39_spill] sm:$0xff] %v3372_v52 }
 0x1d8   : > { %3831 = vst [vmem:[#allocation19_spill] sm:$0xff] %v3376_v9  ;;  %v1587_v61 = vadd.f32 %v1586_v49, %v3372_v52  ;;  %v1402_v35 = vadd.f32 %v1401_v11, %v3376_v9 }
 0x1da   : > { %1588 = vadd.xlane.f32.xlu1 %v1587_v61  ;;  %1403 = vadd.xlane.f32.xlu2 %v1402_v35  ;;  %v1093_v53 = vpop.permute.xlu1 %1092 }
 0x1db   : > { %v1123_v10 = vsel %vm1112_vm3, %v1085_v41, %v1093_v53  ;;  %v3386_v18 = vpop.permute.xlu2 %1184 }
 0x1dc   : > { %v1191_v14 = vpop.permute.xlu0 %1190  ;;  %v1147_v47 = vmul.f32 %v3252_v37, %v1123_v10 }
 0x1dd   : > { %v1209_v57 = vsel %vm1202_vm4, %v1183_v1, %v1191_v14 }
 0x1de   : > { %v1163_v39 = vadd.f32 %v1147_v47, %v3155_v4  ;;  %v1237_v16 = vmul.f32 %v3257_v55, %v1209_v57 }
 0x1e3   : > { %v1109_v12 = vpop.permute.xlu1 %1108 }
 0x1e4   : > { %v1127_v28 = vsel %vm1112_vm3, %v1109_v12, %v1085_v41  ;;  %v1253_v41 = vadd.f32 %v1237_v16, %v1163_v39  ;;  %v1115_v39 = vsel %vm1112_vm3, %v1101_v25, %v1109_v12 }
 0x1e5   : > { %v1146_v3 = vmul.f32 %v3266_v44, %v1127_v28  ;;  %v1270_v28 = vpop.permute.xlu2 %1269 }
 0x1e6   : > { %v1285_v10 = vadd.f32 %v1270_v28, %v1253_v41 }
 0x1e7   : > { %v1162_v32 = vadd.f32 %v1146_v3, %v3163_v42  ;;  %v1119_v42 = vsel %vm1112_vm3, %v1093_v53, %v1101_v25 }
 0x1e8   : > { %v1301_v57 = vadd.f32 3.0, %v1285_v10 }
 0x1ea   : > { %v1317_v41 = vmax.f32 %v1301_v57, 0.0 }
 0x1ec   : > { %v1175_v49 = vpop.permute.xlu1 %1174  ;;  %v1087_v11 = vpop.permute.xlu0 %1086  ;;  %v1333_v52 = vmin.f32 %v1317_v41, 6.0 }
 0x1ed   : > { %v1213_v61 = vsel %vm1202_vm4, %v1175_v49, %v1183_v1  ;;  %v1148_v1 = vmul.f32 %v3271_v20, %v1119_v42 }
 0x1ee   : > { %v1236_v35 = vmul.f32 %v3269_v62, %v1213_v61 }
 0x1f0   : > { %v1252_v9 = vadd.f32 %v1236_v35, %v1162_v32  ;;  %v1164_v35 = vadd.f32 %v1148_v1, %v3160_v2  ;;  %v1212_v2 = vsel %vm1202_vm4, %v3347_v34, %v3260_v8  ;;  %v1216_v1 = vsel %vm1202_vm4, %v3309_v17, %v3347_v34 }
 0x1f1   : > { %v1232_v34 = vmul.f32 %v3269_v62, %v1212_v2 }
 0x1f2   : > { %v1284_v3 = vadd.f32 %v1270_v28, %v1252_v9 }
 0x1f4   : > { %v1199_v38 = vpop.permute.xlu1 %1198  ;;  %v1300_v16 = vadd.f32 3.0, %v1284_v3 }
 0x1f5   : > { %v1111_v13 = vpop.permute.xlu0 %1110  ;;  %v1205_v4 = vsel %vm1202_vm4, %v1191_v14, %v1199_v38  ;;  %v1217_v9 = vsel %vm1202_vm4, %v1199_v38, %v1175_v49  ;;  %v1149_v14 = vmul.f32 %v3279_v24, %v1115_v39 }
 0x1f6   : > { %v1128_v47 = vsel %vm1112_vm3, %v1111_v13, %v1087_v11  ;;  %v1238_v53 = vmul.f32 %v3290_v22, %v1205_v4  ;;  %v1316_v42 = vmax.f32 %v1300_v16, 0.0  ;;  %v1239_v43 = vmul.f32 %v3292_v23, %v1217_v9 }
 0x1f7   : > { %v1150_v32 = vmul.f32 %v3266_v44, %v1128_v47  ;;  %v1165_v47 = vadd.f32 %v1149_v14, %v3172_v40  ;;  %v1208_v40 = vsel %vm1202_vm4, %v3260_v8, %v3351_v29 }
 0x1f8   : > { %v1254_v12 = vadd.f32 %v1238_v53, %v1164_v35  ;;  %v1332_v38 = vmin.f32 %v1316_v42, 6.0  ;;  %v1235_v53 = vmul.f32 %v3292_v23, %v1216_v1  ;;  %v1233_v14 = vmul.f32 %v3257_v55, %v1208_v40  ;;  %v3832_v35 = vld [vmem:[#allocation49_spill] sm:$0xff] }
 0x1f9   : > { %v3411_v61 = vadd.f32 %v1150_v32, %v3212_v26  ;;  %v1255_v49 = vadd.f32 %v1239_v43, %v1165_v47  ;;  %v1114_v26 = vsel %vm1112_vm3, %v3300_v6, %v3284_v56  ;;  %v1349_v43 = vmul.f32 %v1333_v52, %v1285_v10 }
 0x1fa   : > { %v1286_v4 = vadd.f32 %v1270_v28, %v1254_v12  ;;  %v1145_v57 = vmul.f32 %v3279_v24, %v1114_v26  ;;  %v1204_v56 = vsel %vm1202_vm4, %v3351_v29, %v3309_v17  ;;  %v1348_v6 = vmul.f32 %v1332_v38, %v1284_v3 }
 0x1fb   : > { %v1287_v39 = vadd.f32 %v1270_v28, %v1255_v49  ;;  %v1234_v52 = vmul.f32 %v3290_v22, %v1204_v56  ;;  %v3444_v10 = vmul.f32 0.16666667, %v1349_v43  ;;  %v1248_v47 = vadd.f32 %v1232_v34, %v3332_v36 }
 0x1fc   : > { %v1095_v25 = vpop.permute.xlu1 %1094  ;;  %v1302_v16 = vadd.f32 3.0, %v1286_v4  ;;  %v1161_v17 = vadd.f32 %v1145_v57, %v3832_v35  ;;  %v1364_v29 = vmul.f32 0.16666667, %v1348_v6  ;;  %v1249_v38 = vadd.f32 %v1233_v14, %v3335_v0 }
 0x1fd   : > { %v1103_v44 = vpop.permute.xlu0 %1102  ;;  %v1124_v8 = vsel %vm1112_vm3, %v1087_v11, %v1095_v25  ;;  %v1303_v28 = vadd.f32 3.0, %v1287_v39  ;;  %v1250_v49 = vadd.f32 %v1234_v52, %v3314_v63 }
 0x1fe   : > { %v1120_v3 = vsel %vm1112_vm3, %v1095_v25, %v1103_v44  ;;  %v1318_v41 = vmax.f32 %v1302_v16, 0.0  ;;  %v1151_v42 = vmul.f32 %v3252_v37, %v1124_v8  ;;  %v1116_v12 = vsel %vm1112_vm3, %v1103_v44, %v1111_v13 }
 0x1ff   : > { %v1251_v11 = vadd.f32 %v1235_v53, %v1161_v17  ;;  %v1152_v26 = vmul.f32 %v3271_v20, %v1120_v3  ;;  %v3461_v25 = vmul.f32 %v3329_v45, %v3444_v10  ;;  %v1153_v37 = vmul.f32 %v3279_v24, %v1116_v12 }
 0x200   : > { %v1319_v0 = vmax.f32 %v1303_v28, 0.0  ;;  %v3468_v63 = vmul.f32 %v3325_v50, %v1364_v29  ;;  %v1334_v20 = vmin.f32 %v1318_v41, 6.0  ;;  %v1167_v44 = vadd.f32 %v1151_v42, %v3214_v7 }
 0x202   : > { %v1335_v21 = vmin.f32 %v1319_v0, 6.0 }
 0x204   : > { %v1177_v32 = vpop.permute.xlu1 %1176 }
 0x205   : > { %v1193_v9 = vpop.permute.xlu0 %1192  ;;  %v1214_v2 = vsel %vm1202_vm4, %v1177_v32, %v3386_v18 }
 0x206   : > { %v1210_v36 = vsel %vm1202_vm4, %v3386_v18, %v1193_v9  ;;  %v1240_v24 = vmul.f32 %v3269_v62, %v1214_v2  ;;  %v3477_v18 = vmul.f32 %v3321_v46, %v1364_v29  ;;  %v1169_v62 = vadd.f32 %v1153_v37, %v3218_v19 }
 0x207   : > { %v1241_v6 = vmul.f32 %v3257_v55, %v1210_v36  ;;  %v1350_v55 = vmul.f32 %v1334_v20, %v1286_v4 }
 0x208   : > { %v1256_v35 = vadd.f32 %v1240_v24, %v3411_v61 }
 0x209   : > { %v1257_v28 = vadd.f32 %v1241_v6, %v1167_v44 }
 0x20c   : > { %v1201_v13 = vpop.permute.xlu1 %1200 }
 0x20d   : > { %v1206_v1 = vsel %vm1202_vm4, %v1193_v9, %v1201_v13  ;;  %v1218_v40 = vsel %vm1202_vm4, %v1201_v13, %v1177_v32  ;;  %v1266_v43 = vpop.permute.xlu0 %1265  ;;  %v1168_v32 = vadd.f32 %v1152_v26, %v3216_v54 }
 0x20e   : > { %v1280_v57 = vadd.f32 %v1266_v43, %v1248_v47  ;;  %v1281_v56 = vadd.f32 %v1266_v43, %v1249_v38  ;;  %v1242_v16 = vmul.f32 %v3290_v22, %v1206_v1  ;;  %v1282_v34 = vadd.f32 %v1266_v43, %v1250_v49 }
 0x20f   : > { %v1283_v7 = vadd.f32 %v1266_v43, %v1251_v11  ;;  %v1243_v53 = vmul.f32 %v3292_v23, %v1218_v40  ;;  %v1351_v11 = vmul.f32 %v1335_v21, %v1287_v39  ;;  %v1366_v21 = vmul.f32 0.16666667, %v1350_v55 }
 0x210   : > { %v1296_v9 = vadd.f32 3.0, %v1280_v57  ;;  %v1297_v14 = vadd.f32 3.0, %v1281_v56  ;;  %v1298_v8 = vadd.f32 3.0, %v1282_v34  ;;  %v1258_v22 = vadd.f32 %v1242_v16, %v1168_v32 }
 0x211   : > { %v1299_v52 = vadd.f32 3.0, %v1283_v7  ;;  %v1259_v42 = vadd.f32 %v1243_v53, %v1169_v62 }
 0x212   : > { %v1312_v17 = vmax.f32 %v1296_v9, 0.0  ;;  %v1313_v29 = vmax.f32 %v1297_v14, 0.0  ;;  %v1314_v3 = vmax.f32 %v1298_v8, 0.0 }
 0x213   : > { %v1315_v41 = vmax.f32 %v1299_v52, 0.0 }
 0x214   : > { %v1328_v23 = vmin.f32 %v1312_v17, 6.0  ;;  %v1329_v12 = vmin.f32 %v1313_v29, 6.0  ;;  %v1274_v47 = vpop.permute.xlu1 %1273  ;;  %v1330_v38 = vmin.f32 %v1314_v3, 6.0 }
 0x215   : > { %v1288_v54 = vadd.f32 %v1274_v47, %v1256_v35  ;;  %v1289_v49 = vadd.f32 %v1274_v47, %v1257_v28  ;;  %v1290_v19 = vadd.f32 %v1274_v47, %v1258_v22  ;;  %v1291_v37 = vadd.f32 %v1274_v47, %v1259_v42 }
 0x216   : > { %v1344_v26 = vmul.f32 %v1328_v23, %v1280_v57  ;;  %v1345_v2 = vmul.f32 %v1329_v12, %v1281_v56  ;;  %v1331_v61 = vmin.f32 %v1315_v41, 6.0  ;;  %v1346_v36 = vmul.f32 %v1330_v38, %v1282_v34 }
 0x217   : > { %v1304_v13 = vadd.f32 3.0, %v1288_v54  ;;  %v1305_v4 = vadd.f32 3.0, %v1289_v49  ;;  %v1306_v0 = vadd.f32 3.0, %v1290_v19  ;;  %v1307_v1 = vadd.f32 3.0, %v1291_v37 }
 0x218   : > { %v1360_v20 = vmul.f32 0.16666667, %v1344_v26  ;;  %v1361_v44 = vmul.f32 0.16666667, %v1345_v2  ;;  %v1347_v40 = vmul.f32 %v1331_v61, %v1283_v7  ;;  %v1362_v39 = vmul.f32 0.16666667, %v1346_v36 }
 0x219   : > { %v1320_v43 = vmax.f32 %v1304_v13, 0.0  ;;  %v1321_v24 = vmax.f32 %v1305_v4, 0.0  ;;  %v1322_v6 = vmax.f32 %v1306_v0, 0.0  ;;  %v1323_v16 = vmax.f32 %v1307_v1, 0.0 }
 0x21a   : > { %v1363_v53 = vmul.f32 0.16666667, %v1347_v40  ;;  %v3486_v9 = vmul.f32 %v3321_v46, %v1360_v20  ;;  %v3489_v57 = vmul.f32 %v3327_v60, %v1361_v44  ;;  %v3492_v32 = vmul.f32 %v3337_v27, %v1362_v39 }
 0x21b   : > { %v1336_v56 = vmin.f32 %v1320_v43, 6.0  ;;  %v1337_v34 = vmin.f32 %v1321_v24, 6.0  ;;  %v1338_v14 = vmin.f32 %v1322_v6, 6.0  ;;  %v3497_v62 = vmul.f32 %v3325_v50, %v1360_v20 }
 0x21c   : > { %v1590_v7 = vadd.f32 %v3489_v57, %v3486_v9  ;;  %v3500_v8 = vmul.f32 %v3329_v45, %v1361_v44  ;;  %v3503_v29 = vmul.f32 %v3349_v5, %v1363_v53  ;;  %v3507_v28 = vmul.f32 %v3342_v30, %v1362_v39 }
 0x21d   : > { %v1352_v52 = vmul.f32 %v1336_v56, %v1288_v54  ;;  %v1353_v35 = vmul.f32 %v1337_v34, %v1289_v49  ;;  %v1354_v17 = vmul.f32 %v1338_v14, %v1290_v19  ;;  %v1339_v3 = vmin.f32 %v1323_v16, 6.0  ;;  %v1372_v56 = vld [vmem:[%s3718_s1] sm:$0x1] }
 0x21e   : > { %v1591_v55 = vadd.f32 %v1590_v7, %v3492_v32  ;;  %v1405_v22 = vadd.f32 %v3500_v8, %v3497_v62  ;;  %v3512_v12 = vmul.f32 %v3342_v30, %v1366_v21  ;;  %v3516_v38 = vmul.f32 %v3356_v15, %v1363_v53 }
 0x21f   : > { %v1368_v41 = vmul.f32 0.16666667, %v1352_v52  ;;  %v1369_v42 = vmul.f32 0.16666667, %v1353_v35  ;;  %v1370_v23 = vmul.f32 0.16666667, %v1354_v17  ;;  %v1355_v49 = vmul.f32 %v1339_v3, %v1291_v37 }
 0x220   : > { %v1592_v47 = vadd.f32 %v1591_v55, %v3503_v29  ;;  %v1406_v54 = vadd.f32 %v1405_v22, %v3507_v28  ;;  %v1410_v2 = vadd.f32 %v3461_v25, %v3468_v63  ;;  %v3529_v61 = vmul.f32 %v3327_v60, %v3444_v10 }
 0x221   : > { %v3520_v19 = vmul.f32 %v3325_v50, %v1368_v41  ;;  %v3523_v26 = vmul.f32 %v3329_v45, %v1369_v42  ;;  %v1371_v13 = vmul.f32 0.16666667, %v1355_v49  ;;  %v1367_v4 = vmul.f32 0.16666667, %v1351_v11 }
 0x222   : > { %1593 = vadd.xlane.f32.xlu2 %v1592_v47  ;;  %v1407_v36 = vadd.f32 %v1406_v54, %v3516_v38  ;;  %v3533_v37 = vmul.f32 %v3337_v27, %v1366_v21  ;;  %v3536_v50 = vmul.f32 %v3342_v30, %v1370_v23  ;;  %v1411_v0 = vadd.f32 %v1410_v2, %v3512_v12 }
 0x223   : > { %v1415_v45 = vadd.f32 %v3523_v26, %v3520_v19  ;;  %v1595_v10 = vadd.f32 %v3529_v61, %v3477_v18  ;;  %v3544_v20 = vmul.f32 %v3321_v46, %v1368_v41  ;;  %v3547_v11 = vmul.f32 %v3327_v60, %v1369_v42 }
 0x224   : > { %1408 = vadd.xlane.f32.xlu0 %v1407_v36  ;;  %v3550_v44 = vmul.f32 %v3356_v15, %v1371_v13  ;;  %v3554_v1 = vmul.f32 %v3356_v15, %v1367_v4  ;;  %v3560_v46 = vmul.f32 %v3349_v5, %v1367_v4  ;;  %v3566_v39 = vmul.f32 %v3337_v27, %v1370_v23 }
 0x225   : > { %v1416_v30 = vadd.f32 %v1415_v45, %v3536_v50  ;;  %v1596_v40 = vadd.f32 %v1595_v10, %v3533_v37  ;;  %v1600_v60 = vadd.f32 %v3547_v11, %v3544_v20  ;;  %v3570_v16 = vmul.f32 %v3349_v5, %v1371_v13  ;;  %v3581_v5 = vld [vmem:[%s3718_s1] sm:$0xff] }
 0x226   : > { %v1412_v24 = vadd.f32 %v1411_v0, %v3554_v1 }
 0x227   : > { %v1417_v43 = vadd.f32 %v1416_v30, %v3550_v44  ;;  %v1597_v6 = vadd.f32 %v1596_v40, %v3560_v46  ;;  %v1601_v15 = vadd.f32 %v1600_v60, %v3566_v39 }
 0x229   : > { %1418 = vadd.xlane.f32.xlu1 %v1417_v43  ;;  %v1602_v53 = vadd.f32 %v1601_v15, %v3570_v16 }
 0x22a   : > { %1413 = vadd.xlane.f32.xlu2 %v1412_v24 }
 0x22c   : > { %1598 = vadd.xlane.f32.xlu0 %v1597_v6 }
 0x232   : > { %1603 = vadd.xlane.f32.xlu2 %v1602_v53 }
 0x240   : > { %1443 = vrot.lane.b32.xlu0 %v1372_v56, %s2242_s17  ;;  %s3667_s17 = scalar_lea.vmem [#allocation7], %s1942_s16 }
 0x241   : > { %s1847_s22 = sshll.u32 %s3667_s17, 4  ;;  %s1848_s22 = int_to_ptr.vmem [resolvable:$true] %s1847_s22 }
 0x24d   : > { %v1404_v34 = vpop.xlane.xlu2 %1403  ;;  %v1589_v14 = vpop.xlane.xlu1 %1588 }
 0x24e   : > { %v1420_v27 = vmul.f32 0.00390625, %v1404_v34  ;;  %v1605_v42 = vmul.f32 0.00390625, %v1589_v14 }
 0x250   : > { %v1424_v17 = vmul.f32 %v3581_v5, %v1420_v27  ;;  %v1609_v0 = vmul.f32 %v3581_v5, %v1605_v42 }
 0x252   : > { %v1429_v54 = vsel %vm1428_vm5, %v1424_v17, 0.0  ;;  %v1613_v15 = vsel %vm1428_vm5, %v1609_v0, 0.0 }
 0x295   : > { %v1594_v21 = vpop.xlane.xlu2 %1593 }
 0x296   : > { %v1606_v55 = vmul.f32 0.00390625, %v1594_v21 }
 0x297   : > { %v1409_v7 = vpop.xlane.xlu0 %1408 }
 0x298   : > { %v1421_v52 = vmul.f32 0.00390625, %v1409_v7  ;;  %v1610_v2 = vmul.f32 %v3242_v48, %v1606_v55 }
 0x29a   : > { %v1425_v35 = vmul.f32 %v3242_v48, %v1421_v52  ;;  %v1614_v43 = vsel %vm1428_vm5, %v1610_v2, 0.0 }
 0x29b   : > { %v1615_v34 = vadd.f32 %v1614_v43, %v1613_v15 }
 0x29c   : > { %v1419_v22 = vpop.xlane.xlu1 %1418  ;;  %v1430_v23 = vsel %vm1428_vm5, %v1425_v35, 0.0 }
 0x29d   : > { %v1423_v3 = vmul.f32 0.00390625, %v1419_v22  ;;  %v1414_v41 = vpop.xlane.xlu2 %1413  ;;  %v1431_v45 = vadd.f32 %v1430_v23, %v1429_v54 }
 0x29e   : > { %v1422_v47 = vmul.f32 0.00390625, %v1414_v41 }
 0x29f   : > { %v1599_v49 = vpop.xlane.xlu0 %1598  ;;  %v1427_v36 = vmul.f32 %v3248_v51, %v1423_v3 }
 0x2a0   : > { %v1426_v13 = vmul.f32 %v3223_v59, %v1422_v47  ;;  %v1607_v4 = vmul.f32 0.00390625, %v1599_v49 }
 0x2a1   : > { %v1434_v24 = vsel %vm1428_vm5, %v1427_v36, 0.0 }
 0x2a2   : > { %v1432_v10 = vsel %vm1428_vm5, %v1426_v13, 0.0  ;;  %v1611_v30 = vmul.f32 %v3223_v59, %v1607_v4 }
 0x2a3   : > { %v1433_v40 = vadd.f32 %v1432_v10, %v1431_v45 }
 0x2a4   : > { %v1616_v53 = vsel %vm1428_vm5, %v1611_v30, 0.0 }
 0x2a5   : > { %v1435_v60 = vadd.f32 %v1434_v24, %v1433_v40  ;;  %v1604_v6 = vpop.xlane.xlu2 %1603  ;;  %v1617_v27 = vadd.f32 %v1616_v53, %v1615_v34 }
 0x2a6   : > { %v1608_v56 = vmul.f32 0.00390625, %v1604_v6 }
 0x2a7   : > { %v1436_v14 = vrot.slane %v1435_v60, 4 }
 0x2a8   : > { %v1612_v21 = vmul.f32 %v3248_v51, %v1608_v56 }
 0x2a9   : > { %v1437_v7 = vadd.f32 %v1436_v14, %v1435_v60 }
 0x2aa   : > { %v1618_v52 = vsel %vm1428_vm5, %v1612_v21, 0.0 }
 0x2ab   : > { %v1619_v35 = vadd.f32 %v1618_v52, %v1617_v27  ;;  %v1438_v17 = vrot.slane %v1437_v7, 2 }
 0x2ad   : > { %v1620_v55 = vrot.slane %v1619_v35, 4  ;;  %v1439_v22 = vadd.f32 %v1438_v17, %v1437_v7 }
 0x2af   : > { %v1621_v3 = vadd.f32 %v1620_v55, %v1619_v35  ;;  %v1440_v41 = vrot.slane %v1439_v22, 1 }
 0x2b1   : > { %v1441_v42 = vadd.f32 %v1440_v41, %v1439_v22  ;;  %v1622_v23 = vrot.slane %v1621_v3, 2 }
 0x2b2   : > { %v1444_v47 = vpop.permute.xlu0 %1443 }
 0x2b3   : > { %v1623_v54 = vadd.f32 %v1622_v23, %v1621_v3  ;;  %v1446_v49 = vadd.f32 %v1444_v47, %v1441_v42 }
 0x2b5   : > { %v1624_v2 = vrot.slane %v1623_v54, 1  ;;  %v1447_v36 = vmax.f32 %v1446_v49, 0.0 }
 0x2b7   : > { %v1625_v13 = vadd.f32 %v1624_v2, %v1623_v54  ;;  %v1448_v4 = vperm.slane %v1447_v36, 0  ;;  %v2245_v2 = vmov 18  }
 0x2b8   : > { %2081 = vset.pattern.permute.xlu1 %v2245_v2  ;;  %2082 = vset.pattern.permute.xlu0 %v2245_v2 }
 0x2b9   : > { %v1626_v45 = vadd.f32 %v1625_v13, %v1444_v47  ;;  %1450 = vrot.lane.b32.xlu1 %v1448_v4, %s2243_s13  ;;  %2083 = vset.pattern.permute.xlu2 %v2245_v2 }
 0x2bb   : > { %v1627_v0 = vmax.f32 %v1626_v45, 0.0 }
 0x2bd   : > { %v1628_v10 = vperm.slane %v1627_v0, 0 }
 0x2bf   : > { %1630 = vrot.lane.b32.xlu2 %v1628_v10, %s2243_s13  ;;  %s2178_s13 = scalar_lea.hbm %s3722_s5, 256 }
 0x2c0   : > { %p2180_p4 = scmp.lt.s32.totalorder %s2178_s13, %s2174_s10 }
 0x2c2   : > { %p2181_p7 = por %p2180_p4, %p2179_p3 }
 0x2c4   : > { %p2182_p8 = pnand %p2181_p7, %p2177_p2 }
 0x319   : > { %v1631_v30 = vpop.permute.xlu2 %1630 }
 0x31a   : > { %v1636_v40 = vmul.f32 %v3248_v51, %v1631_v30  ;;  %v1633_v43 = vmul.f32 %v3581_v5, %v1631_v30  ;;  %v1635_v53 = vmul.f32 %v3223_v59, %v1631_v30  ;;  %v1634_v34 = vmul.f32 %v3242_v48, %v1631_v30 }
 0x31c   : > { %1647 = vrot.lane.b32.xlu2 %v1636_v40, %s2244_s14 }
 0x324   : > { %1641 = vrot.lane.b32.xlu2 %v1633_v43, %s2244_s14 }
 0x32b   : > { %v1451_v24 = vpop.permute.xlu1 %1450 }
 0x32c   : > { %v1456_v60 = vmul.f32 %v3248_v51, %v1451_v24  ;;  %v1455_v6 = vmul.f32 %v3223_v59, %v1451_v24  ;;  %v1453_v15 = vmul.f32 %v3581_v5, %v1451_v24  ;;  %v1454_v56 = vmul.f32 %v3242_v48, %v1451_v24 }
 0x32e   : > { %1467 = vrot.lane.b32.xlu1 %v1456_v60, %s2244_s14  ;;  %1465 = vrot.lane.b32.xlu0 %v1455_v6, %s2244_s14 }
 0x336   : > { %1461 = vrot.lane.b32.xlu1 %v1453_v15, %s2244_s14  ;;  %1645 = vrot.lane.b32.xlu0 %v1635_v53, %s2244_s14 }
 0x33e   : > { %1463 = vrot.lane.b32.xlu0 %v1454_v56, %s2244_s14  ;;  %1643 = vrot.lane.b32.xlu1 %v1634_v34, %s2244_s14 }
 0x376   : > { %v1648_v52 = vpop.permute.xlu2 %1647 }
 0x377   : > { %v1662_v55 = vsel %vm1473_vm6, %v1648_v52, 0.0 }
 0x37e   : > { %v1642_v41 = vpop.permute.xlu2 %1641 }
 0x37f   : > { %v1653_v49 = vsel %vm1473_vm6, %v1642_v41, 0.0 }
 0x3a0   : > { %v1468_v14 = vpop.permute.xlu1 %1467  ;;  %v1466_v21 = vpop.permute.xlu0 %1465 }
 0x3a1   : > { %v1480_v27 = vsel %vm1473_vm6, %v1466_v21, 0.0  ;;  %v1483_v7 = vsel %vm1473_vm6, %v1468_v14, 0.0 }
 0x3a2   : > { %1481 = vadd.xlane.f32.xlu0 %v1480_v27  ;;  %1484 = vadd.xlane.f32.xlu2 %v1483_v7 }
 0x3a8   : > { %v1462_v35 = vpop.permute.xlu1 %1461  ;;  %v1646_v17 = vpop.permute.xlu0 %1645 }
 0x3a9   : > { %v1659_v22 = vsel %vm1473_vm6, %v1646_v17, 0.0  ;;  %v1474_v3 = vsel %vm1473_vm6, %v1462_v35, 0.0 }
 0x3aa   : > { %1663 = vadd.xlane.f32.xlu0 %v1662_v55  ;;  %1660 = vadd.xlane.f32.xlu1 %v1659_v22 }
 0x3ab   : > { %1475 = vadd.xlane.f32.xlu2 %v1474_v3 }
 0x3b0   : > { %v1464_v42 = vpop.permute.xlu0 %1463  ;;  %v1644_v23 = vpop.permute.xlu1 %1643 }
 0x3b1   : > { %v1477_v47 = vsel %vm1473_vm6, %v1464_v42, 0.0  ;;  %v1656_v54 = vsel %vm1473_vm6, %v1644_v23, 0.0 }
 0x3b2   : > { %1478 = vadd.xlane.f32.xlu1 %v1477_v47  ;;  %1654 = vadd.xlane.f32.xlu0 %v1653_v49 }
 0x3b3   : > { %1657 = vadd.xlane.f32.xlu2 %v1656_v54 }
 0x415   : > { %v1482_v36 = vpop.xlane.xlu0 %1481  ;;  %v1485_v13 = vpop.xlane.xlu2 %1484 }
 0x416   : > { %v1488_v4 = vadd.f32 %v3223_v59, %v1482_v36  ;;  %v1489_v45 = vadd.f32 %v3248_v51, %v1485_v13 }
 0x418   : > { %v1492_v0 = vmul.f32 0.16666667, %v1488_v4  ;;  %v1493_v10 = vmul.f32 0.16666667, %v1489_v45 }
 0x41a   : > { %v1496_v30 = vadd.f32 0.5, %v1492_v0  ;;  %v1497_v40 = vadd.f32 0.5, %v1493_v10 }
 0x41c   : > { %v1500_v43 = vmax.f32 %v1496_v30, 0.0  ;;  %v1501_v24 = vmax.f32 %v1497_v40, 0.0 }
 0x41d   : > { %v1664_v60 = vpop.xlane.xlu0 %1663  ;;  %v1661_v6 = vpop.xlane.xlu1 %1660 }
 0x41e   : > { %v1504_v15 = vmin.f32 %v1500_v43, 1.0  ;;  %v1505_v53 = vmin.f32 %v1501_v24, 1.0  ;;  %v1668_v56 = vadd.f32 %v3248_v51, %v1664_v60  ;;  %v1667_v34 = vadd.f32 %v3223_v59, %v1661_v6  ;;  %v1476_v14 = vpop.xlane.xlu2 %1475 }
 0x41f   : > { %v1486_v21 = vadd.f32 %v3581_v5, %v1476_v14 }
 0x420   : > { %v1672_v27 = vmul.f32 0.16666667, %v1668_v56  ;;  %v1671_v7 = vmul.f32 0.16666667, %v1667_v34  ;;  %1518 = vperm.xlu1 %2081, %v1504_v15   ;;  %1523 = vperm.xlu0 %2082, %v1505_v53  }
 0x421   : > { %v1490_v52 = vmul.f32 0.16666667, %v1486_v21 }
 0x422   : > { %v1676_v35 = vadd.f32 0.5, %v1672_v27  ;;  %v1675_v17 = vadd.f32 0.5, %v1671_v7  ;;  %v3627_v7 = vld [vmem:[#allocation2] sm:$0xff] }
 0x423   : > { %v1494_v3 = vadd.f32 0.5, %v1490_v52  ;;  %v3629_v52 = vld [vmem:[#allocation2 + $0x8] sm:$0xff] }
 0x424   : > { %v1680_v55 = vmax.f32 %v1676_v35, 0.0  ;;  %v1679_v22 = vmax.f32 %v1675_v17, 0.0  ;;  %v2246_v35 = vmov 32  }
 0x425   : > { %v1479_v41 = vpop.xlane.xlu1 %1478  ;;  %v1655_v42 = vpop.xlane.xlu0 %1654  ;;  %v1498_v36 = vmax.f32 %v1494_v3, 0.0 }
 0x426   : > { %v1684_v23 = vmin.f32 %v1680_v55, 1.0  ;;  %v1683_v47 = vmin.f32 %v1679_v22, 1.0  ;;  %v1487_v51 = vadd.f32 %v3242_v48, %v1479_v41  ;;  %v1665_v59 = vadd.f32 %v3581_v5, %v1655_v42  ;;  %v1658_v54 = vpop.xlane.xlu2 %1657 }
 0x427   : > { %v1666_v49 = vadd.f32 %v3242_v48, %v1658_v54  ;;  %v1502_v10 = vmin.f32 %v1498_v36, 1.0 }
 0x428   : > { %v1491_v2 = vmul.f32 0.16666667, %v1487_v51  ;;  %1702 = vperm.xlu1 %2081, %v1684_v23   ;;  %1697 = vperm.xlu2 %2083, %v1683_v47   ;;  %v1669_v4 = vmul.f32 0.16666667, %v1665_v59 }
 0x429   : > { %v1670_v45 = vmul.f32 0.16666667, %v1666_v49  ;;  %2084 = vset.pattern.permute.xlu0 %v2246_v35 }
 0x42a   : > { %v1495_v13 = vadd.f32 0.5, %v1491_v2  ;;  %v1673_v40 = vadd.f32 0.5, %v1669_v4  ;;  %1750 = vperm.xlu0 %2084, %v3627_v7  }
 0x42b   : > { %v1674_v43 = vadd.f32 0.5, %v1670_v45  ;;  %v3834_v45 = vld [vmem:[#allocation30_spill] sm:$0xff] }
 0x42c   : > { %v1499_v0 = vmax.f32 %v1495_v13, 0.0  ;;  %v1677_v24 = vmax.f32 %v1673_v40, 0.0  ;;  %v3833_v13 = vld [vmem:[#allocation39_spill] sm:$0xff]  ;;  %v3836_v40 = vld [vmem:[#allocation21_spill] sm:$0xff] }
 0x42d   : > { %v1678_v60 = vmax.f32 %v1674_v43, 0.0 }
 0x42e   : > { %v1503_v30 = vmin.f32 %v1499_v0, 1.0  ;;  %v1681_v5 = vmin.f32 %v1677_v24, 1.0  ;;  %v3837_v24 = vld [vmem:[#allocation19_spill] sm:$0xff] }
 0x42f   : > { %v1682_v6 = vmin.f32 %v1678_v60, 1.0 }
 0x430   : > { %1513 = vperm.xlu1 %2081, %v1503_v30   ;;  %1508 = vperm.xlu2 %2083, %v1502_v10   ;;  %v3835_v10 = vld [vmem:[#allocation13_spill] sm:$0xff] }
 0x438   : > { %1687 = vperm.xlu2 %2083, %v1681_v5   ;;  %1692 = vperm.xlu1 %2081, %v1682_v6  }
 0x440   : > { %2085 = vset.pattern.permute.xlu2 %v2246_v35 }
 0x441   : > { %1755 = vperm.xlu2 %2085, %v3629_v52  }
 0x482   : > { %v1698_v48 = vpop.permute.xlu2 %1697 }
 0x483   : > { %v1713_v34 = vmul.f32 %v1698_v48, %v3477_v18  ;;  %v1714_v17 = vmul.f32 %v1698_v48, %v3529_v61  ;;  %v1715_v55 = vmul.f32 %v1698_v48, %v3533_v37 }
 0x48a   : > { %v1509_v3 = vpop.permute.xlu2 %1508 }
 0x48b   : > { %v1526_v0 = vmul.f32 %v1509_v3, %v3834_v45  ;;  %v1527_v30 = vmul.f32 %v1509_v3, %v3835_v10  ;;  %v1528_v43 = vmul.f32 %v1509_v3, %v3836_v40  ;;  %v1529_v60 = vmul.f32 %v1509_v3, %v3837_v24 }
 0x492   : > { %v1519_v15 = vpop.permute.xlu1 %1518  ;;  %v1524_v53 = vpop.permute.xlu0 %1523 }
 0x493   : > { %v1534_v56 = vmul.f32 %v1519_v15, %v3468_v63  ;;  %v1535_v14 = vmul.f32 %v1519_v15, %v3461_v25  ;;  %v1536_v21 = vmul.f32 %v1519_v15, %v3512_v12  ;;  %v1537_v27 = vmul.f32 %v1519_v15, %v3554_v1 }
 0x494   : > { %v1716_v63 = vmul.f32 %v1698_v48, %v3560_v46  ;;  %v1538_v18 = vmul.f32 %v1524_v53, %v3520_v19  ;;  %v1539_v12 = vmul.f32 %v1524_v53, %v3523_v26  ;;  %v1540_v1 = vmul.f32 %v1524_v53, %v3536_v50 }
 0x495   : > { %v1541_v22 = vmul.f32 %v1524_v53, %v3550_v44  ;;  %v1729_v42 = vadd.f32 %v1713_v34, %v1534_v56  ;;  %v1730_v23 = vadd.f32 %v1714_v17, %v1535_v14  ;;  %v1731_v47 = vadd.f32 %v1715_v55, %v1536_v21 }
 0x496   : > { %v1732_v51 = vadd.f32 %v1716_v63, %v1537_v27 }
 0x49a   : > { %v1703_v25 = vpop.permute.xlu1 %1702 }
 0x49b   : > { %v1717_v61 = vmul.f32 %v1703_v25, %v3544_v20  ;;  %v1718_v37 = vmul.f32 %v1703_v25, %v3547_v11  ;;  %v1719_v46 = vmul.f32 %v1703_v25, %v3566_v39  ;;  %v1720_v41 = vmul.f32 %v1703_v25, %v3570_v16  ;;  %v1688_v11 = vpop.permute.xlu2 %1687 }
 0x49c   : > { %v1705_v39 = vmul.f32 %v1688_v11, %v3340_v33  ;;  %v1706_v16 = vmul.f32 %v1688_v11, %v3354_v31  ;;  %v1707_v36 = vmul.f32 %v1688_v11, %v3362_v58  ;;  %v1708_v4 = vmul.f32 %v1688_v11, %v3833_v13  ;;  %v2097_v13 = vld [vmem:[%s2357_s8 + $0x38] sm:$0xff] }
 0x49d   : > { %v1733_v19 = vadd.f32 %v1717_v61, %v1538_v18  ;;  %v1734_v59 = vadd.f32 %v1718_v37, %v1539_v12  ;;  %v1735_v26 = vadd.f32 %v1719_v46, %v1540_v1  ;;  %v1736_v54 = vadd.f32 %v1720_v41, %v1541_v22  ;;  %v2091_v12 = vld [vmem:[%s2357_s8 + $0x8] sm:$0xff] }
 0x49e   : > { %v1721_v34 = vadd.f32 %v1705_v39, %v1526_v0  ;;  %v1722_v14 = vadd.f32 %v1706_v16, %v1527_v30  ;;  %v1723_v21 = vadd.f32 %v1707_v36, %v1528_v43  ;;  %v1724_v27 = vadd.f32 %v1708_v4, %v1529_v60  ;;  %v2096_v16 = vld [vmem:[%s2357_s8 + $0x30] sm:$0xff] }
 0x49f   : > { %v1744_v50 = vpack.c.bf16 %v1733_v19, %v1729_v42  ;;  %v1745_v49 = vpack.c.bf16 %v1734_v59, %v1730_v23  ;;  %v1746_v44 = vpack.c.bf16 %v1735_v26, %v1731_v47  ;;  %v1747_v2 = vpack.c.bf16 %v1736_v54, %v1732_v51  ;;  %v2092_v51 = vld [vmem:[%s2357_s8 + $0x10] sm:$0xff]  ;;  %v2093_v59 = vld [vmem:[%s2357_s8 + $0x18] sm:$0xff]  ;;  %v2094_v54 = vld [vmem:[%s2357_s8 + $0x20] sm:$0xff] }
 0x4a1   : > { %1768 = vmatpush.bf16.msrb.mxu0 %v1744_v50  ;;  %1782 = vmatpush.bf16.msrb.mxu1 %v1745_v49  ;;  %v2095_v49 = vld [vmem:[%s2357_s8 + $0x28] sm:$0xff] }
 0x4a2   : > { %1796 = vmatpush.bf16.msrb.mxu2 %v1746_v44  ;;  %1810 = vmatpush.bf16.msrb.mxu3 %v1747_v2  ;;  %v1514_v20 = vpop.permute.xlu1 %1513 }
 0x4a3   : > { %v1530_v6 = vmul.f32 %v1514_v20, %v3497_v62  ;;  %v1531_v48 = vmul.f32 %v1514_v20, %v3500_v8  ;;  %v1532_v33 = vmul.f32 %v1514_v20, %v3507_v28  ;;  %v1533_v31 = vmul.f32 %v1514_v20, %v3516_v38  ;;  %v1756_v22 = vpop.permute.xlu2 %1755 }
 0x4aa   : > { %v1693_v5 = vpop.permute.xlu1 %1692 }
 0x4ab   : > { %v1709_v58 = vmul.f32 %v1693_v5, %v3486_v9  ;;  %v1710_v15 = vmul.f32 %v1693_v5, %v3489_v57  ;;  %v1711_v53 = vmul.f32 %v1693_v5, %v3492_v32  ;;  %v1712_v56 = vmul.f32 %v1693_v5, %v3503_v29  ;;  %v1751_v32 = vpop.permute.xlu0 %1750 }
 0x4ac   : > { %v1739_v57 = vpack.c.bf16 %v3629_v52, %v3627_v7  ;;  %v2090_v7 = vld [vmem:[%s2357_s8] sm:$0xff] }
 0x4ad   : > { %v1725_v35 = vadd.f32 %v1709_v58, %v1530_v6  ;;  %v1726_v62 = vadd.f32 %v1710_v15, %v1531_v48  ;;  %v1727_v17 = vadd.f32 %v1711_v53, %v1532_v33  ;;  %v1728_v8 = vadd.f32 %v1712_v56, %v1533_v31 }
 0x4af   : > { %v1740_v28 = vpack.c.bf16 %v1725_v35, %v1721_v34  ;;  %v1741_v38 = vpack.c.bf16 %v1726_v62, %v1722_v14  ;;  %v1742_v55 = vpack.c.bf16 %v1727_v17, %v1723_v21  ;;  %v1743_v9 = vpack.c.bf16 %v1728_v8, %v1724_v27 }
 0x4b1   : > { %1769 = vmatpush.bf16.msrb.mxu0 %v1740_v28  ;;  %1783 = vmatpush.bf16.msrb.mxu1 %v1741_v38 }
 0x4b2   : > { %1797 = vmatpush.bf16.msrb.mxu2 %v1742_v55  ;;  %1811 = vmatpush.bf16.msrb.mxu3 %v1743_v9 }
 0x4b4   : > { %1985 = vmatmul.msk.bf16.vlgmr.msrb.gmra.mxu0 %vm1758_vm7, %v1739_v57  ;;  %1986 = vmatmul.msk.bf16.vlgmr.msrb.gmra.mxu1 %vm1758_vm7, %v1739_v57 }
 0x4b5   : > { %1987 = vmatmul.msk.bf16.vlgmr.msrb.gmra.mxu2 %vm1758_vm7, %v1739_v57  ;;  %1988 = vmatmul.msk.bf16.vlgmr.msrb.gmra.mxu3 %vm1758_vm7, %v1739_v57 }
 0x531   : > { %v1771_v29 = vpop.f32.mrf.mxu0  ;;  %v1785_v63 = vpop.f32.mrf.mxu1 }
 0x532   : > { %v1772_v25 = vadd.f32 %v1771_v29, %v1751_v32  ;;  %v1786_v18 = vadd.f32 %v1785_v63, %v1751_v32 }
 0x534   : > { %v1818_v52 = vadd.f32 %v2090_v7, %v1772_v25  ;;  %v1819_v1 = vadd.f32 %v2091_v12, %v1786_v18 }
 0x536   : > { %1826 = vst [vmem:[%s3667_s17] sm:$0xff] %v1818_v52 }
 0x537   : > { %1827 = vst [vmem:[%s3667_s17 + $0x8] sm:$0xff] %v1819_v1 }
 0x538   : > { %v1799_v3 = vpop.f32.mrf.mxu2  ;;  %v1813_v61 = vpop.f32.mrf.mxu3 }
 0x539   : > { %v1800_v37 = vadd.f32 %v1799_v3, %v1751_v32  ;;  %v1814_v46 = vadd.f32 %v1813_v61, %v1751_v32  ;;  %v1773_v41 = vpop.f32.mrf.mxu0  ;;  %v1787_v42 = vpop.f32.mrf.mxu1 }
 0x53a   : > { %v1774_v23 = vadd.f32 %v1773_v41, %v1756_v22  ;;  %v1788_v47 = vadd.f32 %v1787_v42, %v1756_v22 }
 0x53b   : > { %v1820_v19 = vadd.f32 %v2092_v51, %v1800_v37  ;;  %v1821_v26 = vadd.f32 %v2093_v59, %v1814_v46 }
 0x53c   : > { %v1822_v50 = vadd.f32 %v2094_v54, %v1774_v23  ;;  %v1823_v44 = vadd.f32 %v2095_v49, %v1788_v47 }
 0x53d   : > { %1828 = vst [vmem:[%s3667_s17 + $0x10] sm:$0xff] %v1820_v19 }
 0x53e   : > { %1829 = vst [vmem:[%s3667_s17 + $0x18] sm:$0xff] %v1821_v26 }
 0x53f   : > { %1830 = vst [vmem:[%s3667_s17 + $0x20] sm:$0xff] %v1822_v50 }
 0x540   : > { %v1801_v2 = vpop.f32.mrf.mxu2  ;;  %v1815_v20 = vpop.f32.mrf.mxu3  ;;  %1831 = vst [vmem:[%s3667_s17 + $0x28] sm:$0xff] %v1823_v44 }
 0x541   : > { %v1802_v11 = vadd.f32 %v1801_v2, %v1756_v22  ;;  %v1816_v39 = vadd.f32 %v1815_v20, %v1756_v22 }
 0x543   : > { %v1824_v36 = vadd.f32 %v2096_v16, %v1802_v11  ;;  %v1825_v4 = vadd.f32 %v2097_v13, %v1816_v39 }
 0x545   : > { %1832 = vst [vmem:[%s3667_s17 + $0x30] sm:$0xff] %v1824_v36 }
 0x546   : > { %1833 = vst [vmem:[%s3667_s17 + $0x38] sm:$0xff] %v1825_v4 }
 0x547   : > { %2185 = shalt.err (!%p2182_p8)
}
 0x548   : > { %s2247_s15 = smov 512   ;;  %s2248_s16 = smov 32  }
 0x549   : > { %2004 = dma.vmem_to_hbm [thread:$0]  (%p2317_p5), %s1848_s22, 1024, %s1850_s6, %s1835_s7, %s2247_s15, %s2247_s15, %s2248_s16  }
 0x54a PF: > { %p2021_p9 = scmp.ge.s32.totalorder %s2228_s21, 2  ;;  %s1864_s17 = sand.u32 1, %s2216_s18  }
 0x54b   : > { %s1865_s23 = scalar_lea.sflag [#allocation4], %s1864_s17 }
 0x54c   : > { %p2014_p10 = pnand %p2021_p9, %p2321_p6 }
 0x54e   : > { %p2015_p11 = pneg %p2014_p10 }
 0x550   : > { %2211 = dma.done.wait (%p2015_p11), %s1865_s23, 1024  }
 0x551   : > { %2213 = vsyncadd (%p2015_p11), %s1865_s23, 4294966272  ;;  %p17_p12 = scmp.ge.s32.totalorder %s2304_s24, 6   ;;  %s3838_s18 = smov %s2220_s19 }
 0x552   : > { %s3839_s19 = smov %s2224_s20  ;;  %s3840_s20 = smov %s2315_s27 }
 0x553   : > { %s3841_s21 = smov %s2304_s24  ;;  %19 = sbr.rel (!%p17_p12) target bundleno = 5 (0x5), region = 97 }
 0x558   :  { %1871 = vsyncpa [#allocation3], 1 }
 0x559   :  { %1873 = vsyncpa [#allocation3 + $0x1], 1 }
 0x55a   :  { %1874 = vsyncpa [#allocation6], 1 }
 0x55b   :  { %1875 = vsyncpa [#allocation4], 1 }
 0x55c   :  { %1877 = vsyncpa [#allocation4 + $0x1], 1 }

</bundles_post_ra>
